<compile_context>
chip_gen: v5e
topology: v5e:2x2
jax: 0.10.0
libtpu: 0.0.40
codegen_flags: <defaults>
</compile_context>

<pallas_src>
import functools

import jax
import jax.numpy as jnp
import numpy as np
from jax.experimental import pallas as pl
from jax.experimental.pallas import tpu as pltpu

FEATURE_SIZE = 64
HEADS = 4
FPH = FEATURE_SIZE // HEADS  # 16 features per head


def _pad8(n):
    return ((n + 7) // 8) * 8


def _slab_a_offsets(d_in, n_blocks):
    """Row offsets inside the wide (EF-column) slab: w1 | b1 | w2 | b2 | w_expand."""
    E = n_blocks + 1
    EF = E * FEATURE_SIZE
    EH = E * HEADS
    sections = [("w1", d_in), ("b1", 1), ("w2", EF), ("b2", 1), ("w_expand", EH)]
    offs = {}
    r = 0
    for name, nrows in sections:
        offs[name] = r
        r += _pad8(nrows)
    offs["rows"] = r
    return offs


# ---------------------------------------------------------------------------
# Pallas kernel: raw obs -> embeddings -> multi-head ego attention -> combine
# ---------------------------------------------------------------------------
def _ban_kernel(x_ref, a_ref, kvq_ref, n_ref, o_ref, *, d_in, n_blocks):
    E = n_blocks + 1
    EF = E * FEATURE_SIZE
    EH = E * HEADS
    offs = _slab_a_offsets(d_in, n_blocks)

    dot = lambda a, b: jnp.dot(a, b, preferred_element_type=jnp.float32)
    relu = lambda t: jnp.maximum(t, 0.0)

    x = x_ref[...]                                            # (tb, D) raw observation

    # --- weight views (static row/column bands of the packed slabs) ---
    r = offs["w1"]
    w1 = a_ref[r:r + d_in, :]                                 # split_input folded into rows
    b1 = a_ref[offs["b1"]:offs["b1"] + 1, :]
    r = offs["w2"]
    w2 = a_ref[r:r + EF, :]
    b2 = a_ref[offs["b2"]:offs["b2"] + 1, :]
    r = offs["w_expand"]
    w_expand = a_ref[r:r + EH, :]                             # (EH, EF) structural expand
    w_cc = n_ref[:, 0:FEATURE_SIZE]                           # (EF, 64)  wc stacked per entity
    w_score = n_ref[:, FEATURE_SIZE:FEATURE_SIZE + EH]        # (EF, EH)  segment-sum * 1/sqrt(dk)

    # --- embedding MLPs for ego + every block, lane-dense over entities ---
    h1 = relu(dot(x, w1) + b1)                                # (tb, EF)
    h2 = relu(dot(h1, w2) + b2)                               # (tb, EF); ego emb = lanes [0:64)

    # --- K | V | Q (ego query replicated per entity) in ONE fused MXU pass ---
    kvq = dot(h2, kvq_ref[...])                               # (tb, 3*EF)
    k_all = kvq[:, 0:EF]
    v_all = kvq[:, EF:2 * EF]
    q_t = kvq[:, 2 * EF:3 * EF]

    # --- scores per (entity, head): lane col = e*HEADS + h ---
    scores = dot(q_t * k_all, w_score)                        # (tb, EH)

    # --- numerically stable softmax over entities within each head (VPU/XLU only) ---
    m = scores[:, 0:HEADS]
    for e in range(1, E):
        m = jnp.maximum(m, scores[:, e * HEADS:(e + 1) * HEADS])
    ex = jnp.exp(scores - jnp.concatenate([m] * E, axis=1))   # single EUP exp
    den = ex[:, 0:HEADS]
    for e in range(1, E):
        den = den + ex[:, e * HEADS:(e + 1) * HEADS]
    inv = pl.reciprocal(den, approx=True)                     # EUP divide
    inv = inv * (2.0 - den * inv)                             # one Newton step -> ~f32 accuracy
    p = ex * jnp.concatenate([inv] * E, axis=1)               # (tb, EH) attention probs

    # --- attention-weighted values; head/entity collapse + attention_combine fused ---
    p_full = dot(p, w_expand)                                 # (tb, EF)
    val = dot(p_full * v_all, w_cc)                           # (tb, 64)

    ego = h2[:, 0:FEATURE_SIZE]
    o_ref[...] = (val + ego) * 0.5


# ---------------------------------------------------------------------------
# Wrapper: raw x + packed weight slabs -> pallas_call (batch = parallel grid axis)
# ---------------------------------------------------------------------------
def _choose_tb(B):
    """Whole batch up to 128 rows; for larger batches pick a multiple-of-8 divisor of B
    that yields >=2 grid steps (v7x dual TensorCore), capped at 512 rows."""
    if B <= 128:
        return B
    cand = min(512, B // 2)
    cand -= cand % 8
    while cand >= 8:
        if B % cand == 0:
            return cand
        cand -= 8
    return B


def block_attention_network(x, packed):
    slab_a, slab_kvq, slab_n = packed
    B, D = x.shape
    n_blocks = (D // 2 - 5) // 3
    E = n_blocks + 1
    EF = E * FEATURE_SIZE
    EH = E * HEADS

    tb = _choose_tb(B)
    assert B % tb == 0
    grid = (B // tb,)

    # Advisory cost so XLA can overlap the (otherwise un-overlapped) slab DMA upstream.
    cost = pl.CostEstimate(
        flops=2 * B * (D * EF + EF * EF + EF * 3 * EF + EF * EH + EH * EF + EF * FEATURE_SIZE),
        transcendentals=B * (EH + HEADS),
        bytes_accessed=4 * (x.size + slab_a.size + slab_kvq.size + slab_n.size
                            + B * FEATURE_SIZE),
    )

    def const_spec(shape):
        return pl.BlockSpec(shape, lambda i: (0, 0))

    return pl.pallas_call(
        functools.partial(_ban_kernel, d_in=D, n_blocks=n_blocks),
        out_shape=jax.ShapeDtypeStruct((B, FEATURE_SIZE), jnp.float32),
        grid=grid,
        in_specs=[pl.BlockSpec((tb, D), lambda i: (i, 0)),
                  const_spec(slab_a.shape),
                  const_spec(slab_kvq.shape),
                  const_spec(slab_n.shape)],
        out_specs=pl.BlockSpec((tb, FEATURE_SIZE), lambda i: (i, 0)),
        compiler_params=pltpu.CompilerParams(dimension_semantics=("parallel",)),
        cost_estimate=cost,
    )(x, slab_a, slab_kvq, slab_n)


# ---------------------------------------------------------------------------
# One-time parameter packing (numpy, done at init; never in the hot path)
# ---------------------------------------------------------------------------
def pack_params(params, d_in, n_blocks):
    E = n_blocks + 1
    EF = E * FEATURE_SIZE
    EH = E * HEADS
    split = d_in // 2
    g = {k: np.asarray(v, np.float32) for k, v in params.items()}

    # ---- slab A (wide, EF columns): w1 | b1 | w2 | b2 | w_expand ----
    offs = _slab_a_offsets(d_in, n_blocks)
    A = np.zeros((offs["rows"], EF), np.float32)

    # layer 1: fold split_input's column selection into the weight rows
    r = offs["w1"]
    sel_g = list(range(5)) + list(range(split, split + 5))
    for i, c in enumerate(sel_g):
        A[r + c, 0:FEATURE_SIZE] = g["w1g"][i]
    for n in range(n_blocks):
        sel_n = (list(range(5 + 3 * n, 5 + 3 * n + 3)) +
                 list(range(split + 5 + 3 * n, split + 5 + 3 * n + 3)))
        lo = (n + 1) * FEATURE_SIZE
        for i, c in enumerate(sel_n):
            A[r + c, lo:lo + FEATURE_SIZE] = g["w1e"][i]

    # biases
    A[offs["b1"], 0:FEATURE_SIZE] = g["b1g"].ravel()
    A[offs["b1"], FEATURE_SIZE:] = np.tile(g["b1e"].ravel(), n_blocks)
    A[offs["b2"], 0:FEATURE_SIZE] = g["b2g"].ravel()
    A[offs["b2"], FEATURE_SIZE:] = np.tile(g["b2e"].ravel(), n_blocks)

    # layer 2: block-diagonal (gripper MLP for entity 0, block MLP for entities 1..N)
    r = offs["w2"]
    A[r:r + FEATURE_SIZE, 0:FEATURE_SIZE] = g["w2g"]
    for n in range(n_blocks):
        lo = (n + 1) * FEATURE_SIZE
        A[r + lo:r + lo + FEATURE_SIZE, lo:lo + FEATURE_SIZE] = g["w2e"]

    # expand a per-(entity, head) probability to the 16 lanes of that head
    r = offs["w_expand"]
    for e in range(E):
        for h in range(HEADS):
            cols = e * FEATURE_SIZE + h * FPH
            A[r + e * HEADS + h, cols:cols + FPH] = 1.0

    # ---- slab B: fused K | V | Q projection, (EF, 3*EF) ----
    Bm = np.zeros((EF, 3 * EF), np.float32)
    for e in range(E):
        lo = e * FEATURE_SIZE
        Bm[lo:lo + FEATURE_SIZE, lo:lo + FEATURE_SIZE] = g["wk"]                      # K block-diag
        Bm[lo:lo + FEATURE_SIZE, EF + lo:EF + lo + FEATURE_SIZE] = g["wv"]            # V block-diag
        Bm[0:FEATURE_SIZE, 2 * EF + lo:2 * EF + lo + FEATURE_SIZE] = g["wq"]          # Q ego->every entity

    # ---- slab C (narrow, 128-wide column bands): w_cc | w_score ----
    ncols = -(-(FEATURE_SIZE + EH) // 128) * 128
    C = np.zeros((EF, ncols), np.float32)
    inv_sqrt_dk = 1.0 / np.sqrt(FPH)
    for e in range(E):
        lo = e * FEATURE_SIZE
        C[lo:lo + FEATURE_SIZE, 0:FEATURE_SIZE] = g["wc"]     # attention_combine, entity collapse folded
        for h in range(HEADS):
            rows = lo + h * FPH
            C[rows:rows + FPH, FEATURE_SIZE + e * HEADS + h] = inv_sqrt_dk

    return jnp.asarray(A), jnp.asarray(Bm), jnp.asarray(C)


# ---------------------------------------------------------------------------
# Deterministic parameter init (shapes from the module's __init__)
# ---------------------------------------------------------------------------
def make_params(key):
    def xavier(k, shape):
        fan_in, fan_out = shape
        lim = (6.0 / (fan_in + fan_out)) ** 0.5
        return jax.random.uniform(k, shape, jnp.float32, -lim, lim)

    ks = jax.random.split(key, 12)
    return dict(
        w1g=xavier(ks[0], (10, 64)),
        b1g=0.05 * jax.random.normal(ks[8], (64,), jnp.float32),
        w2g=xavier(ks[1], (64, 64)),
        b2g=0.05 * jax.random.normal(ks[9], (64,), jnp.float32),
        w1e=xavier(ks[2], (6, 64)),
        b1e=0.05 * jax.random.normal(ks[10], (64,), jnp.float32),
        w2e=xavier(ks[3], (64, 64)),
        b2e=0.05 * jax.random.normal(ks[11], (64,), jnp.float32),
        wk=xavier(ks[4], (64, 64)),
        wv=xavier(ks[5], (64, 64)),
        wq=xavier(ks[6], (64, 64)),
        wc=xavier(ks[7], (64, 64)),
    )


# ---------------------------------------------------------------------------
# Pure-JAX reference mirroring the PyTorch forward (for verification)
# ---------------------------------------------------------------------------
def reference(x, p):
    B, D = x.shape
    split = D // 2
    N = (split - 5) // 3
    gripper = jnp.concatenate([x[:, :5], x[:, split:split + 5]], axis=1)
    blocks = jnp.stack(
        [jnp.concatenate([x[:, 5 + 3 * n:5 + 3 * n + 3],
                          x[:, split + 5 + 3 * n:split + 5 + 3 * n + 3]], axis=1)
         for n in range(N)], axis=1)                                    # (B, N, 6)
    ego = jax.nn.relu(gripper @ p['w1g'] + p['b1g'])
    ego = jax.nn.relu(ego @ p['w2g'] + p['b2g'])
    oth = jax.nn.relu(blocks @ p['w1e'] + p['b1e'])
    oth = jax.nn.relu(oth @ p['w2e'] + p['b2e'])                        # (B, N, 64)
    input_all = jnp.concatenate([ego[:, None, :], oth], axis=1)         # (B, E, 64)
    E = N + 1
    K = (input_all @ p['wk']).reshape(B, E, HEADS, FPH).transpose(0, 2, 1, 3)
    V = (input_all @ p['wv']).reshape(B, E, HEADS, FPH).transpose(0, 2, 1, 3)
    Q = (ego @ p['wq']).reshape(B, 1, HEADS, FPH).transpose(0, 2, 1, 3)
    scores = jnp.einsum('bhqf,bhef->bhqe', Q, K) / (FPH ** 0.5)
    pa = jax.nn.softmax(scores, axis=-1)
    val = jnp.einsum('bhqe,bhef->bhqf', pa, V).reshape(B, FEATURE_SIZE)
    return (val @ p['wc'] + ego) / 2


if __name__ == "__main__":
    key = jax.random.PRNGKey(0)
    kx, kp = jax.random.split(key)

    B, n_blocks = 8, 4
    D = 2 * (5 + 3 * n_blocks)            # 34 observation features
    x = jax.random.normal(kx, (B, D), dtype=jnp.float32)
    params = make_params(kp)
    packed = pack_params(params, D, n_blocks)   # one-time packing, outside the hot path

    out = jax.block_until_ready(block_attention_network(x, packed))
    assert out.shape == (B, FEATURE_SIZE)

    ref = reference(x, params)
    np.testing.assert_allclose(np.asarray(out), np.asarray(ref), rtol=2e-4, atol=2e-4)

    print("KERNEL_OK")
</pallas_src>

<mosaic_0001>
module attributes {stable_mosaic.version = 11 : i64} {
  func.func @_ban_kernel(%arg0: i32, %arg1: memref<8x34xf32, #tpu.memory_space<vmem>>, %arg2: memref<400x320xf32, #tpu.memory_space<vmem>>, %arg3: memref<320x960xf32, #tpu.memory_space<vmem>>, %arg4: memref<320x128xf32, #tpu.memory_space<vmem>>, %arg5: memref<8x64xf32, #tpu.memory_space<vmem>>) attributes {dimension_semantics = [#tpu.dimension_semantics<parallel>], iteration_bounds = array<i64: 1>, scalar_prefetch = 0 : i64, scratch_operands = 0 : i64, tpu.core_type = #tpu.core_type<tc>, window_params = [{transform_indices = @transform_0, window_bounds = array<i64: 8, 34>}, {pipeline_mode = #tpu.pipeline_mode<synchronous>, transform_indices = @transform_1, window_bounds = array<i64: 400, 320>}, {pipeline_mode = #tpu.pipeline_mode<synchronous>, transform_indices = @transform_2, window_bounds = array<i64: 320, 960>}, {pipeline_mode = #tpu.pipeline_mode<synchronous>, transform_indices = @transform_3, window_bounds = array<i64: 320, 128>}, {transform_indices = @transform_4, window_bounds = array<i64: 8, 64>}]} {
    %c0 = arith.constant 0 : index
    %c0_0 = arith.constant 0 : index
    %0 = vector.load %arg1[%c0, %c0_0] : memref<8x34xf32, #tpu.memory_space<vmem>>, vector<8x34xf32>
    %c0_1 = arith.constant 0 : index
    %c0_2 = arith.constant 0 : index
    %1 = vector.load %arg2[%c0_1, %c0_2] : memref<400x320xf32, #tpu.memory_space<vmem>>, vector<34x320xf32>
    %c40 = arith.constant 40 : index
    %c0_3 = arith.constant 0 : index
    %2 = vector.load %arg2[%c40, %c0_3] : memref<400x320xf32, #tpu.memory_space<vmem>>, vector<1x320xf32>
    %c48 = arith.constant 48 : index
    %c0_4 = arith.constant 0 : index
    %3 = vector.load %arg2[%c48, %c0_4] : memref<400x320xf32, #tpu.memory_space<vmem>>, vector<320x320xf32>
    %c368 = arith.constant 368 : index
    %c0_5 = arith.constant 0 : index
    %4 = vector.load %arg2[%c368, %c0_5] : memref<400x320xf32, #tpu.memory_space<vmem>>, vector<1x320xf32>
    %c376 = arith.constant 376 : index
    %c0_6 = arith.constant 0 : index
    %5 = vector.load %arg2[%c376, %c0_6] : memref<400x320xf32, #tpu.memory_space<vmem>>, vector<20x320xf32>
    %c0_7 = arith.constant 0 : index
    %c0_8 = arith.constant 0 : index
    %6 = vector.load %arg4[%c0_7, %c0_8] : memref<320x128xf32, #tpu.memory_space<vmem>>, vector<320x64xf32>
    %c0_9 = arith.constant 0 : index
    %c64 = arith.constant 64 : index
    %7 = vector.load %arg4[%c0_9, %c64] : memref<320x128xf32, #tpu.memory_space<vmem>>, vector<320x20xf32>
    %cst = arith.constant dense<0.000000e+00> : vector<8x320xf32>
    %8 = tpu.matmul %0, %1, %cst {dimension_numbers = #tpu.dot_dimension_numbers<[1], [0], [0], [1], [0, 0, 1, 1], [], []>} : vector<8x34xf32>, vector<34x320xf32>, vector<8x320xf32> -> vector<8x320xf32>
    %9 = vector.broadcast %2 : vector<1x320xf32> to vector<8x320xf32>
    %10 = arith.addf %8, %9 : vector<8x320xf32>
    %cst_10 = arith.constant 0.000000e+00 : f32
    %11 = vector.broadcast %cst_10 : f32 to vector<8x320xf32>
    %12 = arith.maximumf %10, %11 : vector<8x320xf32>
    %cst_11 = arith.constant dense<0.000000e+00> : vector<8x320xf32>
    %13 = tpu.matmul %12, %3, %cst_11 {dimension_numbers = #tpu.dot_dimension_numbers<[1], [0], [0], [1], [0, 0, 1, 1], [], []>} : vector<8x320xf32>, vector<320x320xf32>, vector<8x320xf32> -> vector<8x320xf32>
    %14 = vector.broadcast %4 : vector<1x320xf32> to vector<8x320xf32>
    %15 = arith.addf %13, %14 : vector<8x320xf32>
    %cst_12 = arith.constant 0.000000e+00 : f32
    %16 = vector.broadcast %cst_12 : f32 to vector<8x320xf32>
    %17 = arith.maximumf %15, %16 : vector<8x320xf32>
    %c0_13 = arith.constant 0 : index
    %c0_14 = arith.constant 0 : index
    %18 = vector.load %arg3[%c0_13, %c0_14] : memref<320x960xf32, #tpu.memory_space<vmem>>, vector<320x960xf32>
    %cst_15 = arith.constant dense<0.000000e+00> : vector<8x960xf32>
    %19 = tpu.matmul %17, %18, %cst_15 {dimension_numbers = #tpu.dot_dimension_numbers<[1], [0], [0], [1], [0, 0, 1, 1], [], []>} : vector<8x320xf32>, vector<320x960xf32>, vector<8x960xf32> -> vector<8x960xf32>
    %20 = vector.extract_strided_slice %19 {offsets = [0, 0], sizes = [8, 320], strides = [1, 1]} : vector<8x960xf32> to vector<8x320xf32>
    %21 = vector.extract_strided_slice %19 {offsets = [0, 320], sizes = [8, 320], strides = [1, 1]} : vector<8x960xf32> to vector<8x320xf32>
    %22 = vector.extract_strided_slice %19 {offsets = [0, 640], sizes = [8, 320], strides = [1, 1]} : vector<8x960xf32> to vector<8x320xf32>
    %23 = arith.mulf %22, %20 : vector<8x320xf32>
    %cst_16 = arith.constant dense<0.000000e+00> : vector<8x20xf32>
    %24 = tpu.matmul %23, %7, %cst_16 {dimension_numbers = #tpu.dot_dimension_numbers<[1], [0], [0], [1], [0, 0, 1, 1], [], []>} : vector<8x320xf32>, vector<320x20xf32>, vector<8x20xf32> -> vector<8x20xf32>
    %25 = vector.extract_strided_slice %24 {offsets = [0, 0], sizes = [8, 4], strides = [1, 1]} : vector<8x20xf32> to vector<8x4xf32>
    %26 = vector.extract_strided_slice %24 {offsets = [0, 4], sizes = [8, 4], strides = [1, 1]} : vector<8x20xf32> to vector<8x4xf32>
    %27 = arith.maximumf %25, %26 : vector<8x4xf32>
    %28 = vector.extract_strided_slice %24 {offsets = [0, 8], sizes = [8, 4], strides = [1, 1]} : vector<8x20xf32> to vector<8x4xf32>
    %29 = arith.maximumf %27, %28 : vector<8x4xf32>
    %30 = vector.extract_strided_slice %24 {offsets = [0, 12], sizes = [8, 4], strides = [1, 1]} : vector<8x20xf32> to vector<8x4xf32>
    %31 = arith.maximumf %29, %30 : vector<8x4xf32>
    %32 = vector.extract_strided_slice %24 {offsets = [0, 16], sizes = [8, 4], strides = [1, 1]} : vector<8x20xf32> to vector<8x4xf32>
    %33 = arith.maximumf %31, %32 : vector<8x4xf32>
    %34 = tpu.concatenate %33, %33, %33, %33, %33 in 1 : vector<8x4xf32>, vector<8x4xf32>, vector<8x4xf32>, vector<8x4xf32>, vector<8x4xf32> -> vector<8x20xf32>
    %35 = arith.subf %24, %34 : vector<8x20xf32>
    %36 = math.exp %35 : vector<8x20xf32>
    %37 = vector.extract_strided_slice %36 {offsets = [0, 0], sizes = [8, 4], strides = [1, 1]} : vector<8x20xf32> to vector<8x4xf32>
    %38 = vector.extract_strided_slice %36 {offsets = [0, 4], sizes = [8, 4], strides = [1, 1]} : vector<8x20xf32> to vector<8x4xf32>
    %39 = arith.addf %37, %38 : vector<8x4xf32>
    %40 = vector.extract_strided_slice %36 {offsets = [0, 8], sizes = [8, 4], strides = [1, 1]} : vector<8x20xf32> to vector<8x4xf32>
    %41 = arith.addf %39, %40 : vector<8x4xf32>
    %42 = vector.extract_strided_slice %36 {offsets = [0, 12], sizes = [8, 4], strides = [1, 1]} : vector<8x20xf32> to vector<8x4xf32>
    %43 = arith.addf %41, %42 : vector<8x4xf32>
    %44 = vector.extract_strided_slice %36 {offsets = [0, 16], sizes = [8, 4], strides = [1, 1]} : vector<8x20xf32> to vector<8x4xf32>
    %45 = arith.addf %43, %44 : vector<8x4xf32>
    %46 = tpu.reciprocal %45 {approx = true} : vector<8x4xf32> -> vector<8x4xf32>
    %47 = arith.mulf %45, %46 : vector<8x4xf32>
    %cst_17 = arith.constant 2.000000e+00 : f32
    %48 = vector.broadcast %cst_17 : f32 to vector<8x4xf32>
    %49 = arith.subf %48, %47 : vector<8x4xf32>
    %50 = arith.mulf %46, %49 : vector<8x4xf32>
    %51 = tpu.concatenate %50, %50, %50, %50, %50 in 1 : vector<8x4xf32>, vector<8x4xf32>, vector<8x4xf32>, vector<8x4xf32>, vector<8x4xf32> -> vector<8x20xf32>
    %52 = arith.mulf %36, %51 : vector<8x20xf32>
    %cst_18 = arith.constant dense<0.000000e+00> : vector<8x320xf32>
    %53 = tpu.matmul %52, %5, %cst_18 {dimension_numbers = #tpu.dot_dimension_numbers<[1], [0], [0], [1], [0, 0, 1, 1], [], []>} : vector<8x20xf32>, vector<20x320xf32>, vector<8x320xf32> -> vector<8x320xf32>
    %54 = arith.mulf %53, %21 : vector<8x320xf32>
    %cst_19 = arith.constant dense<0.000000e+00> : vector<8x64xf32>
    %55 = tpu.matmul %54, %6, %cst_19 {dimension_numbers = #tpu.dot_dimension_numbers<[1], [0], [0], [1], [0, 0, 1, 1], [], []>} : vector<8x320xf32>, vector<320x64xf32>, vector<8x64xf32> -> vector<8x64xf32>
    %56 = vector.extract_strided_slice %17 {offsets = [0, 0], sizes = [8, 64], strides = [1, 1]} : vector<8x320xf32> to vector<8x64xf32>
    %57 = arith.addf %55, %56 : vector<8x64xf32>
    %cst_20 = arith.constant 5.000000e-01 : f32
    %58 = vector.broadcast %cst_20 : f32 to vector<8x64xf32>
    %59 = arith.mulf %57, %58 : vector<8x64xf32>
    %c0_21 = arith.constant 0 : index
    %c0_22 = arith.constant 0 : index
    %60 = vector.load %arg5[%c0_21, %c0_22] : memref<8x64xf32, #tpu.memory_space<vmem>>, vector<8x64xf32>
    tpu.vector_store %arg5[%c0_21, %c0_22], %59 {strides = array<i32>} : memref<8x64xf32, #tpu.memory_space<vmem>>, vector<8x64xf32>,
    return
  }
  func.func @transform_0(%arg0: i32) -> (i32, i32) {
    %c0_i32 = arith.constant 0 : i32
    %c0_i32_0 = arith.constant 0 : i32
    return %arg0, %c0_i32 : i32, i32
  }
  func.func @transform_1(%arg0: i32) -> (i32, i32) {
    %c0_i32 = arith.constant 0 : i32
    %c0_i32_0 = arith.constant 0 : i32
    %c0_i32_1 = arith.constant 0 : i32
    return %c0_i32, %c0_i32_0 : i32, i32
  }
  func.func @transform_2(%arg0: i32) -> (i32, i32) {
    %c0_i32 = arith.constant 0 : i32
    %c0_i32_0 = arith.constant 0 : i32
    %c0_i32_1 = arith.constant 0 : i32
    return %c0_i32, %c0_i32_0 : i32, i32
  }
  func.func @transform_3(%arg0: i32) -> (i32, i32) {
    %c0_i32 = arith.constant 0 : i32
    %c0_i32_0 = arith.constant 0 : i32
    %c0_i32_1 = arith.constant 0 : i32
    return %c0_i32, %c0_i32_0 : i32, i32
  }
  func.func @transform_4(%arg0: i32) -> (i32, i32) {
    %c0_i32 = arith.constant 0 : i32
    %c0_i32_0 = arith.constant 0 : i32
    return %arg0, %c0_i32 : i32, i32
  }
}

</mosaic_0001>

<bundles_post_ra>
// kernel: tpu_custom_call.1
= control target key start
LH: loop header
LB: loop body
LE: loop exit
PB: predicated region body
PF: predicated region fallthrough
CT: control target
= control target key end

     0   :  { %9 = vsyncpa [#allocation3], 0  ;;  %s2460_s0 = inlined_call_operand.hbm [shape: f32[8,34], index: 0, kind: input, shape index: {}]   ;;  %s2461_s1 = inlined_call_operand.hbm [shape: f32[400,320], index: 1, kind: input, shape index: {}]   ;;  %s2462_s2 = inlined_call_operand.hbm [shape: f32[320,960], index: 2, kind: input, shape index: {}]   ;;  %s2463_s3 = inlined_call_operand.hbm [shape: f32[320,128], index: 3, kind: input, shape index: {}]   ;;  %s2464_s4 = inlined_call_operand.hbm [shape: f32[8,64], index: 4, kind: output, shape index: {}]  }
   0x1   :  { %10 = vsyncpa [#allocation6], 0 }
   0x2   :  { %11 = vsyncpa [#allocation9], 0  ;;  %s28_s17 = sshll.u32 %s2461_s1, 4  ;;  %s29_s17 = int_to_ptr.hbm [resolvable:$true] %s28_s17 }
   0x3   :  { %12 = vsyncpa [#allocation4], 0  ;;  %s2110_s18 = smov [#allocation5]   ;;  %s18_s22 = sshll.u32 %s2460_s0, 4  ;;  %s19_s22 = int_to_ptr.hbm [resolvable:$true] %s18_s22 }
   0x4   :  { %s30_s19 = sshll.u32 %s2110_s18, 4  ;;  %s2111_s23 = smov 384   ;;  %s31_s19 = int_to_ptr.vmem [resolvable:$true] %s30_s19 }
   0x5   :  { %s2112_s24 = smov 24   ;;  %s2113_s25 = smov [#allocation2]  }
   0x6   :  { %36 = dma.hbm_to_vmem [thread:$0]  %s29_s17, 19200, %s31_s19, [#allocation6], %s2111_s23, %s2111_s23, %s2112_s24  }
   0x7   :  { %s20_s26 = sshll.u32 %s2113_s25, 4  ;;  %s41_s29 = sshll.u32 %s2462_s2, 4  ;;  %s21_s26 = int_to_ptr.vmem [resolvable:$true] %s20_s26  ;;  %s42_s29 = int_to_ptr.hbm [resolvable:$true] %s41_s29 }
   0x8   :  { %23 = dma.hbm_to_vmem [thread:$0]  %s19_s22, 128, %s21_s26, [#allocation3]  }
   0x9   :  { %s2114_s1 = smov [#allocation7]   ;;  %s54_s0 = sshll.u32 %s2463_s3, 4  ;;  %s55_s0 = int_to_ptr.hbm [resolvable:$true] %s54_s0 }
   0xa   :  { %s43_s30 = sshll.u32 %s2114_s1, 4  ;;  %s2115_s7 = smov 1024   ;;  %s44_s30 = int_to_ptr.vmem [resolvable:$true] %s43_s30 }
   0xb   :  { %s2116_s8 = smov 64   ;;  %s2117_s9 = smov [#allocation8]  }
   0xc   :  { %49 = dma.hbm_to_vmem [thread:$0]  %s42_s29, 40960, %s44_s30, [#allocation6], %s2115_s7, %s2115_s7, %s2116_s8  }
   0xd   :  { %s56_s10 = sshll.u32 %s2117_s9, 4  ;;  %s2118_s11 = smov 128   ;;  %s57_s10 = int_to_ptr.vmem [resolvable:$true] %s56_s10 }
   0xe   :  { %s2119_s2 = smov 8  }
   0xf   :  { %62 = dma.hbm_to_vmem [thread:$0]  %s55_s0, 5120, %s57_s10, [#allocation9], %s2118_s11, %s2118_s11, %s2119_s2  }
  0x10   :  { %2102 = dma.done.wait [#allocation3], 128  }
  0x11   :  { %2103 = vsyncadd [#allocation3], 4294967168 }
  0x12   :  { %2104 = dma.done.wait [#allocation6], 60160  }
  0x13   :  { %2105 = vsyncadd [#allocation6], 4294907136 }
  0x14   :  { %2106 = dma.done.wait [#allocation9], 5120  }
  0x15   :  { %2107 = vsyncadd [#allocation9], 4294962176  ;;  %vm279_vm0 = vcmask 1041408   ;;  %v92_v0 = vld [vmem:[#allocation5 + $0x60] sm:$0x3]  ;;  %v89_v2 = vld [vmem:[#allocation5 + $0x48] sm:$0xff] }
  0x16   :  { %v94_v1 = vld [vmem:[#allocation5 + $0x70] sm:$0x3]  ;;  %1830 = vmatpush.msk.msra.mxu0 %vm279_vm0, %v92_v0  ;;  %v91_v3 = vld [vmem:[#allocation5 + $0x58] sm:$0xff]  ;;  %v88_v5 = vld [vmem:[#allocation5 + $0x40] sm:$0xff]  ;;  %vm275_vm1 = vcmask 277504   ;;  %vm359_vm2 = vcmask 523264  }
  0x17   :  { %1834 = vmatpush.msk.msra.mxu2 %vm279_vm0, %v94_v1  ;;  %v86_v4 = vld [vmem:[#allocation5 + $0x30] sm:$0xff]  ;;  %v83_v6 = vld [vmem:[#allocation5 + $0x18] sm:$0xff]  ;;  %v85_v7 = vld [vmem:[#allocation5 + $0x28] sm:$0xff]  ;;  %s2120_s3 = smov 116   ;;  %s2121_s12 = smov 120   ;;  %vm1605_vm3 = vcmask 31744  }
  0x18   :  { %301 = vmatpush.msra.mxu0 %v89_v2  ;;  %v80_v8 = vld [vmem:[#allocation5] sm:$0xff]  ;;  %v82_v9 = vld [vmem:[#allocation5 + $0x10] sm:$0xff]  ;;  %v142_v10 = vld [vmem:[#allocation5 + $0x1f8] sm:$0xff]  ;;  %s2122_s13 = smov 124   ;;  %s2123_s14 = smov 112   ;;  %vm1607_vm4 = vcmask 64512  }
  0x19   :  { %341 = vmatpush.msra.mxu2 %v91_v3  ;;  %v79_v11 = vld [vmem:[#allocation2] sm:$0xff]  ;;  %v93_v12 = vld [vmem:[#allocation5 + $0x68] sm:$0x3]  ;;  %v143_v13 = vld [vmem:[#allocation5 + $0x200] sm:$0xff]  ;;  %363 = vmatpush.msra.mxu3 %v142_v10  ;;  %s2124_s15 = smov 12   ;;  %s2125_s16 = smov 4  }
  0x1a   :  { %302 = vmatpush.msra.mxu0 %v86_v4  ;;  %v139_v14 = vld [vmem:[#allocation5 + $0x1e0] sm:$0xff]  ;;  %v90_v15 = vld [vmem:[#allocation5 + $0x50] sm:$0xff]  ;;  %v140_v16 = vld [vmem:[#allocation5 + $0x1e8] sm:$0xff]  ;;  %s2126_s17 = smov 16   ;;  %vm1609_vm5 = vcmask 97280   ;;  %vm1611_vm6 = vcmask 130048  }
  0x1b   :  { %342 = vmatpush.msra.mxu2 %v88_v5  ;;  %v136_v17 = vld [vmem:[#allocation5 + $0x1c8] sm:$0xff]  ;;  %v87_v18 = vld [vmem:[#allocation5 + $0x38] sm:$0xff]  ;;  %v137_v19 = vld [vmem:[#allocation5 + $0x1d0] sm:$0xff]  ;;  %364 = vmatpush.msra.mxu3 %v139_v14  ;;  %vm1659_vm7 = vcmask 1043456   ;;  %vm1655_vm8 = vcmask 162816   ;;  %s2127_s18 = smov [#allocation10]  }
  0x1c   :  { %303 = vmatpush.msra.mxu0 %v83_v6  ;;  %v133_v20 = vld [vmem:[#allocation5 + $0x1b0] sm:$0xff]  ;;  %v214_v21 = vld [vmem:[#allocation5 + $0x438] sm:$0xff]  ;;  %v84_v22 = vld [vmem:[#allocation5 + $0x20] sm:$0xff]  ;;  %s1816_s19 = sshll.u32 %s2127_s18, 4  ;;  %s1818_s22 = sshll.u32 %s2464_s4, 4  ;;  %s1817_s19 = int_to_ptr.vmem [resolvable:$true] %s1816_s19  ;;  %s1819_s22 = int_to_ptr.hbm [resolvable:$true] %s1818_s22 }
  0x1d   :  { %343 = vmatpush.msra.mxu2 %v85_v7  ;;  %v134_v23 = vld [vmem:[#allocation5 + $0x1b8] sm:$0xff]  ;;  %365 = vmatpush.msra.mxu3 %v136_v17  ;;  %v211_v24 = vld [vmem:[#allocation5 + $0x420] sm:$0xff]  ;;  %v81_v26 = vld [vmem:[#allocation5 + $0x8] sm:$0xff] }
  0x1e   :  { %304 = vmatpush.msra.mxu0 %v80_v8  ;;  %411 = vmatpush.msra.mxu1 %v214_v21  ;;  %v130_v25 = vld [vmem:[#allocation5 + $0x198] sm:$0xff]  ;;  %v131_v27 = vld [vmem:[#allocation5 + $0x1a0] sm:$0xff]  ;;  %v208_v28 = vld [vmem:[#allocation5 + $0x408] sm:$0xff] }
  0x1f   :  { %344 = vmatpush.msra.mxu2 %v82_v9  ;;  %1831 = vmatmul.msk.f32.vlgmr.msra.gmra.mxu0 %vm275_vm1, %v79_v11  ;;  %v127_v29 = vld [vmem:[#allocation5 + $0x180] sm:$0xff]  ;;  %v190_v30 = vld [vmem:[#allocation5 + $0x378] sm:$0xff]  ;;  %v128_v31 = vld [vmem:[#allocation5 + $0x188] sm:$0xff] }
  0x20   :  { %1835 = vmatmul.msk.f32.vlgmr.msra.gmra.mxu2 %vm275_vm1, %v79_v11  ;;  %1832 = vmatpush.msk.msrb.mxu0 %vm279_vm0, %v93_v12  ;;  %v124_v32 = vld [vmem:[#allocation5 + $0x168] sm:$0xff]  ;;  %v205_v33 = vld [vmem:[#allocation5 + $0x3f0] sm:$0xff]  ;;  %v187_v34 = vld [vmem:[#allocation5 + $0x360] sm:$0xff] }
  0x21   :  { %423 = vmatpush.msrb.mxu2 %v143_v13  ;;  %366 = vmatpush.msra.mxu3 %v133_v20  ;;  %v125_v35 = vld [vmem:[#allocation5 + $0x170] sm:$0xff]  ;;  %v202_v37 = vld [vmem:[#allocation5 + $0x3d8] sm:$0xff]  ;;  %v184_v38 = vld [vmem:[#allocation5 + $0x348] sm:$0xff] }
  0x22   :  { %321 = vmatpush.msrb.mxu0 %v90_v15  ;;  %412 = vmatpush.msra.mxu1 %v211_v24  ;;  %v121_v36 = vld [vmem:[#allocation5 + $0x150] sm:$0xff]  ;;  %v122_v39 = vld [vmem:[#allocation5 + $0x158] sm:$0xff]  ;;  %v199_v41 = vld [vmem:[#allocation5 + $0x3c0] sm:$0xff] }
  0x23   :  { %424 = vmatpush.msrb.mxu2 %v140_v16  ;;  %367 = vmatpush.msra.mxu3 %v130_v25  ;;  %v118_v40 = vld [vmem:[#allocation5 + $0x138] sm:$0xff]  ;;  %v181_v42 = vld [vmem:[#allocation5 + $0x330] sm:$0xff]  ;;  %v119_v43 = vld [vmem:[#allocation5 + $0x140] sm:$0xff] }
  0x24   :  { %322 = vmatpush.msrb.mxu0 %v87_v18  ;;  %413 = vmatpush.msra.mxu1 %v208_v28  ;;  %v115_v44 = vld [vmem:[#allocation5 + $0x120] sm:$0xff]  ;;  %v196_v45 = vld [vmem:[#allocation5 + $0x3a8] sm:$0xff]  ;;  %v178_v46 = vld [vmem:[#allocation5 + $0x318] sm:$0xff] }
  0x25   :  { %425 = vmatpush.msrb.mxu2 %v137_v19  ;;  %368 = vmatpush.msra.mxu3 %v127_v29  ;;  %v116_v47 = vld [vmem:[#allocation5 + $0x128] sm:$0xff]  ;;  %v193_v49 = vld [vmem:[#allocation5 + $0x390] sm:$0xff]  ;;  %v175_v50 = vld [vmem:[#allocation5 + $0x300] sm:$0xff] }
  0x26   :  { %323 = vmatpush.msrb.mxu0 %v84_v22  ;;  %414 = vmatpush.msra.mxu1 %v205_v33  ;;  %v112_v48 = vld [vmem:[#allocation5 + $0x108] sm:$0xff]  ;;  %v113_v51 = vld [vmem:[#allocation5 + $0x110] sm:$0xff]  ;;  %v191_v53 = vld [vmem:[#allocation5 + $0x380] sm:$0xff] }
  0x27   :  { %426 = vmatpush.msrb.mxu2 %v134_v23  ;;  %369 = vmatpush.msra.mxu3 %v124_v32  ;;  %v109_v52 = vld [vmem:[#allocation5 + $0xf0] sm:$0xff]  ;;  %v172_v54 = vld [vmem:[#allocation5 + $0x2e8] sm:$0xff]  ;;  %v110_v55 = vld [vmem:[#allocation5 + $0xf8] sm:$0xff] }
  0x28   :  { %324 = vmatpush.msrb.mxu0 %v81_v26  ;;  %415 = vmatpush.msra.mxu1 %v202_v37  ;;  %v106_v56 = vld [vmem:[#allocation5 + $0xd8] sm:$0xff]  ;;  %v188_v57 = vld [vmem:[#allocation5 + $0x368] sm:$0xff]  ;;  %v169_v58 = vld [vmem:[#allocation5 + $0x2d0] sm:$0xff] }
  0x29   :  { %427 = vmatpush.msrb.mxu2 %v131_v27  ;;  %1833 = vmatmul.msk.f32.vlgmr.msrb.gmra.mxu0 %vm275_vm1, %v79_v11  ;;  %v107_v59 = vld [vmem:[#allocation5 + $0xe0] sm:$0xff]  ;;  %v185_v61 = vld [vmem:[#allocation5 + $0x350] sm:$0xff]  ;;  %v166_v62 = vld [vmem:[#allocation5 + $0x2b8] sm:$0xff] }
  0x2a   :  { %383 = vmatpush.msra.mxu0 %v190_v30  ;;  %370 = vmatpush.msra.mxu3 %v121_v36  ;;  %v103_v60 = vld [vmem:[#allocation5 + $0xc0] sm:$0xff]  ;;  %v104_v63 = vld [vmem:[#allocation5 + $0xc8] sm:$0xff]  ;;  %v182_v1 = vld [vmem:[#allocation5 + $0x338] sm:$0xff] }
  0x2b   :  { %428 = vmatpush.msrb.mxu2 %v128_v31  ;;  %416 = vmatpush.msra.mxu1 %v199_v41  ;;  %v100_v0 = vld [vmem:[#allocation5 + $0xa8] sm:$0xff]  ;;  %v163_v2 = vld [vmem:[#allocation5 + $0x2a0] sm:$0xff]  ;;  %v101_v3 = vld [vmem:[#allocation5 + $0xb0] sm:$0xff] }
  0x2c   :  { %384 = vmatpush.msra.mxu0 %v187_v34  ;;  %371 = vmatpush.msra.mxu3 %v118_v40  ;;  %v97_v4 = vld [vmem:[#allocation5 + $0x90] sm:$0xff]  ;;  %v179_v5 = vld [vmem:[#allocation5 + $0x320] sm:$0xff]  ;;  %v160_v6 = vld [vmem:[#allocation5 + $0x288] sm:$0xff] }
  0x2d   :  { %429 = vmatpush.msrb.mxu2 %v125_v35  ;;  %417 = vmatpush.msra.mxu1 %v196_v45  ;;  %v98_v7 = vld [vmem:[#allocation5 + $0x98] sm:$0xff]  ;;  %v192_v8 = vld [vmem:[#allocation5 + $0x388] sm:$0xff]  ;;  %v215_v9 = vld [vmem:[#allocation5 + $0x440] sm:$0xff] }
  0x2e   :  { %385 = vmatpush.msra.mxu0 %v184_v38  ;;  %372 = vmatpush.msra.mxu3 %v115_v44  ;;  %v157_v10 = vld [vmem:[#allocation5 + $0x270] sm:$0xff]  ;;  %v176_v11 = vld [vmem:[#allocation5 + $0x308] sm:$0xff]  ;;  %v154_v14 = vld [vmem:[#allocation5 + $0x258] sm:$0xff] }
  0x2f   :  { %430 = vmatpush.msrb.mxu2 %v122_v39  ;;  %418 = vmatpush.msra.mxu1 %v193_v49  ;;  %v189_v12 = vld [vmem:[#allocation5 + $0x370] sm:$0xff]  ;;  %v212_v13 = vld [vmem:[#allocation5 + $0x428] sm:$0xff]  ;;  %v186_v15 = vld [vmem:[#allocation5 + $0x358] sm:$0xff] }
  0x30   :  { %386 = vmatpush.msra.mxu0 %v181_v42  ;;  %373 = vmatpush.msra.mxu3 %v112_v48  ;;  %v209_v16 = vld [vmem:[#allocation5 + $0x410] sm:$0xff]  ;;  %v151_v17 = vld [vmem:[#allocation5 + $0x240] sm:$0xff]  ;;  %v206_v19 = vld [vmem:[#allocation5 + $0x3f8] sm:$0xff] }
  0x31   :  { %431 = vmatpush.msrb.mxu2 %v119_v43  ;;  %443 = vmatpush.msrb.mxu1 %v191_v53  ;;  %v183_v18 = vld [vmem:[#allocation5 + $0x340] sm:$0xff]  ;;  %v148_v20 = vld [vmem:[#allocation5 + $0x228] sm:$0xff]  ;;  %v145_v23 = vld [vmem:[#allocation5 + $0x210] sm:$0xff] }
  0x32   :  { %387 = vmatpush.msra.mxu0 %v178_v46  ;;  %374 = vmatpush.msra.mxu3 %v109_v52  ;;  %v180_v21 = vld [vmem:[#allocation5 + $0x328] sm:$0xff]  ;;  %v203_v22 = vld [vmem:[#allocation5 + $0x3e0] sm:$0xff]  ;;  %v177_v25 = vld [vmem:[#allocation5 + $0x310] sm:$0xff] }
  0x33   :  { %432 = vmatpush.msrb.mxu2 %v116_v47  ;;  %444 = vmatpush.msrb.mxu1 %v188_v57  ;;  %v144_v24 = vld [vmem:[#allocation5 + $0x208] sm:$0xff]  ;;  %v141_v26 = vld [vmem:[#allocation5 + $0x1f0] sm:$0xff]  ;;  %v174_v27 = vld [vmem:[#allocation5 + $0x2f8] sm:$0xff] }
  0x34   :  { %388 = vmatpush.msra.mxu0 %v175_v50  ;;  %375 = vmatpush.msra.mxu3 %v106_v56  ;;  %v138_v28 = vld [vmem:[#allocation5 + $0x1d8] sm:$0xff]  ;;  %v171_v29 = vld [vmem:[#allocation5 + $0x2e0] sm:$0xff]  ;;  %v132_v31 = vld [vmem:[#allocation5 + $0x1a8] sm:$0xff] }
  0x35   :  { %433 = vmatpush.msrb.mxu2 %v113_v51  ;;  %445 = vmatpush.msrb.mxu1 %v185_v61  ;;  %v135_v30 = vld [vmem:[#allocation5 + $0x1c0] sm:$0xff]  ;;  %v173_v32 = vld [vmem:[#allocation5 + $0x2f0] sm:$0xff]  ;;  %v168_v33 = vld [vmem:[#allocation5 + $0x2c8] sm:$0xff] }
  0x36   :  { %389 = vmatpush.msra.mxu0 %v172_v54  ;;  %376 = vmatpush.msra.mxu3 %v103_v60  ;;  %v200_v34 = vld [vmem:[#allocation5 + $0x3c8] sm:$0xff]  ;;  %v129_v35 = vld [vmem:[#allocation5 + $0x190] sm:$0xff]  ;;  %v170_v36 = vld [vmem:[#allocation5 + $0x2d8] sm:$0xff] }
  0x37   :  { %434 = vmatpush.msrb.mxu2 %v110_v55  ;;  %446 = vmatpush.msrb.mxu1 %v182_v1  ;;  %v165_v37 = vld [vmem:[#allocation5 + $0x2b0] sm:$0xff]  ;;  %v126_v39 = vld [vmem:[#allocation5 + $0x178] sm:$0xff]  ;;  %v167_v40 = vld [vmem:[#allocation5 + $0x2c0] sm:$0xff] }
  0x38   :  { %390 = vmatpush.msra.mxu0 %v169_v58  ;;  %377 = vmatpush.msra.mxu3 %v100_v0  ;;  %v197_v38 = vld [vmem:[#allocation5 + $0x3b0] sm:$0xff]  ;;  %v162_v41 = vld [vmem:[#allocation5 + $0x298] sm:$0xff]  ;;  %v123_v43 = vld [vmem:[#allocation5 + $0x160] sm:$0xff] }
  0x39   :  { %435 = vmatpush.msrb.mxu2 %v107_v59  ;;  %447 = vmatpush.msrb.mxu1 %v179_v5  ;;  %v194_v42 = vld [vmem:[#allocation5 + $0x398] sm:$0xff]  ;;  %v164_v44 = vld [vmem:[#allocation5 + $0x2a8] sm:$0xff]  ;;  %v159_v45 = vld [vmem:[#allocation5 + $0x280] sm:$0xff] }
  0x3a   :  { %391 = vmatpush.msra.mxu0 %v166_v62  ;;  %378 = vmatpush.msra.mxu3 %v97_v4  ;;  %v120_v46 = vld [vmem:[#allocation5 + $0x148] sm:$0xff]  ;;  %v161_v47 = vld [vmem:[#allocation5 + $0x290] sm:$0xff]  ;;  %v158_v50 = vld [vmem:[#allocation5 + $0x278] sm:$0xff] }
  0x3b   :  { %436 = vmatpush.msrb.mxu2 %v104_v63  ;;  %448 = vmatpush.msrb.mxu1 %v176_v11  ;;  %v156_v48 = vld [vmem:[#allocation5 + $0x268] sm:$0xff]  ;;  %v117_v49 = vld [vmem:[#allocation5 + $0x130] sm:$0xff]  ;;  %v114_v52 = vld [vmem:[#allocation5 + $0x118] sm:$0xff] }
  0x3c   :  { %392 = vmatpush.msra.mxu0 %v163_v2  ;;  %471 = vmatpush.msrb.mxu3 %v215_v9  ;;  %v153_v51 = vld [vmem:[#allocation5 + $0x250] sm:$0xff]  ;;  %v155_v53 = vld [vmem:[#allocation5 + $0x260] sm:$0xff]  ;;  %v150_v54 = vld [vmem:[#allocation5 + $0x238] sm:$0xff] }
  0x3d   :  { %437 = vmatpush.msrb.mxu2 %v101_v3  ;;  %449 = vmatpush.msrb.mxu1 %v173_v32  ;;  %v111_v55 = vld [vmem:[#allocation5 + $0x100] sm:$0xff]  ;;  %v152_v56 = vld [vmem:[#allocation5 + $0x248] sm:$0xff]  ;;  %v149_v59 = vld [vmem:[#allocation5 + $0x230] sm:$0xff] }
  0x3e   :  { %393 = vmatpush.msra.mxu0 %v160_v6  ;;  %472 = vmatpush.msrb.mxu3 %v212_v13  ;;  %v147_v57 = vld [vmem:[#allocation5 + $0x220] sm:$0xff]  ;;  %v108_v58 = vld [vmem:[#allocation5 + $0xe8] sm:$0xff]  ;;  %v105_v60 = vld [vmem:[#allocation5 + $0xd0] sm:$0xff] }
  0x3f   :  { %438 = vmatpush.msrb.mxu2 %v98_v7  ;;  %450 = vmatpush.msrb.mxu1 %v170_v36  ;;  %v146_v61 = vld [vmem:[#allocation5 + $0x218] sm:$0xff]  ;;  %v99_v63 = vld [vmem:[#allocation5 + $0xa0] sm:$0xff]  ;;  %v216_v6 = vld [vmem:[#allocation5 + $0x448] sm:$0xff] }
  0x40   :  { %394 = vmatpush.msra.mxu0 %v157_v10  ;;  %473 = vmatpush.msrb.mxu3 %v209_v16  ;;  %v102_v62 = vld [vmem:[#allocation5 + $0xb8] sm:$0xff]  ;;  %v207_v16 = vld [vmem:[#allocation5 + $0x400] sm:$0xff]  ;;  %v634_v32 = vld [vmem:[#allocation7 + $0x2c0] sm:$0xff] }
  0x41   :  { %503 = vmatpush.msra.mxu2 %v192_v8  ;;  %451 = vmatpush.msrb.mxu1 %v167_v40  ;;  %v96_v0 = vld [vmem:[#allocation5 + $0x78] ss:$8 sm:$0x7]  ;;  %v213_v8 = vld [vmem:[#allocation5 + $0x430] sm:$0xff] }
  0x42   :  { %395 = vmatpush.msra.mxu0 %v154_v14  ;;  %474 = vmatpush.msrb.mxu3 %v206_v19  ;;  %v269_v1 = vperm.slane %v96_v0, 0  ;;  %v271_v5 = vperm.slane %v96_v0, 2  ;;  %v667_v7 = vld [vmem:[#allocation7 + $0x3c8] sm:$0xff] }
  0x43   :  { %504 = vmatpush.msra.mxu2 %v189_v12  ;;  %452 = vmatpush.msrb.mxu1 %v164_v44  ;;  %v659_v9 = vld [vmem:[#allocation7 + $0x388] sm:$0xff]  ;;  %v270_v12 = vperm.slane %v96_v0, 1 }
  0x44   :  { %396 = vmatpush.msra.mxu0 %v151_v17  ;;  %475 = vmatpush.msrb.mxu3 %v203_v22  ;;  %v210_v13 = vld [vmem:[#allocation5 + $0x418] sm:$0xff]  ;;  %v666_v17 = vld [vmem:[#allocation7 + $0x3c0] sm:$0xff] }
  0x45   :  { %505 = vmatpush.msra.mxu2 %v186_v15  ;;  %453 = vmatpush.msrb.mxu1 %v161_v47  ;;  %v651_v14 = vld [vmem:[#allocation7 + $0x348] sm:$0xff]  ;;  %v658_v22 = vld [vmem:[#allocation7 + $0x380] sm:$0xff] }
  0x46   :  { %397 = vmatpush.msra.mxu0 %v148_v20  ;;  %476 = vmatpush.msrb.mxu3 %v200_v34  ;;  %v643_v19 = vld [vmem:[#allocation7 + $0x308] sm:$0xff]  ;;  %v794_v34 = vld [vmem:[#allocation7 + $0x7c0] sm:$0xff] }
  0x47   :  { %506 = vmatpush.msra.mxu2 %v183_v18  ;;  %454 = vmatpush.msrb.mxu1 %v158_v50  ;;  %v611_v36 = vld [vmem:[#allocation7 + $0x208] sm:$0xff]  ;;  %v834_v47 = vld [vmem:[#allocation7 + $0x900] sm:$0xff] }
  0x48   :  { %398 = vmatpush.msra.mxu0 %v145_v23  ;;  %477 = vmatpush.msrb.mxu3 %v197_v38  ;;  %v618_v38 = vld [vmem:[#allocation7 + $0x240] sm:$0xff]  ;;  %v603_v40 = vld [vmem:[#allocation7 + $0x1c8] sm:$0xff] }
  0x49   :  { %507 = vmatpush.msra.mxu2 %v180_v21  ;;  %455 = vmatpush.msrb.mxu1 %v155_v53  ;;  %v204_v21 = vld [vmem:[#allocation5 + $0x3e8] sm:$0xff]  ;;  %v595_v44 = vld [vmem:[#allocation7 + $0x188] sm:$0xff]  ;;  %v594_v50 = vld [vmem:[#allocation7 + $0x180] sm:$0xff] }
  0x4a   :  { %483 = vmatpush.msrb.mxu0 %v144_v24  ;;  %478 = vmatpush.msrb.mxu3 %v194_v42  ;;  %v201_v24 = vld [vmem:[#allocation5 + $0x3d0] sm:$0xff]  ;;  %v555_v0 = vld [vmem:[#allocation7 + $0x48] sm:$0xff] }
  0x4b   :  { %508 = vmatpush.msra.mxu2 %v177_v25  ;;  %456 = vmatpush.msrb.mxu1 %v152_v56  ;;  %v650_v25 = vld [vmem:[#allocation7 + $0x340] sm:$0xff]  ;;  %v571_v56 = vld [vmem:[#allocation7 + $0xc8] sm:$0xff] }
  0x4c   :  { %484 = vmatpush.msrb.mxu0 %v141_v26  ;;  %v635_v26 = vld [vmem:[#allocation7 + $0x2c8] sm:$0xff]  ;;  %v610_v42 = vld [vmem:[#allocation7 + $0x200] sm:$0xff] }
  0x4d   :  { %509 = vmatpush.msra.mxu2 %v174_v27  ;;  %457 = vmatpush.msrb.mxu1 %v149_v59  ;;  %v858_v27 = vld [vmem:[#allocation7 + $0x9c0] sm:$0xff] }
  0x4e   :  { %485 = vmatpush.msrb.mxu0 %v138_v28  ;;  %v198_v28 = vld [vmem:[#allocation5 + $0x3b8] sm:$0xff]  ;;  %v754_v53 = vld [vmem:[#allocation7 + $0x680] sm:$0xff] }
  0x4f   :  { %510 = vmatpush.msra.mxu2 %v171_v29  ;;  %458 = vmatpush.msrb.mxu1 %v146_v61  ;;  %v642_v29 = vld [vmem:[#allocation7 + $0x300] sm:$0xff] }
  0x50   :  { %486 = vmatpush.msrb.mxu0 %v135_v30  ;;  %v627_v30 = vld [vmem:[#allocation7 + $0x288] sm:$0xff]  ;;  %v810_v59 = vld [vmem:[#allocation7 + $0x840] sm:$0xff] }
  0x51   :  { %511 = vmatpush.msra.mxu2 %v168_v33  ;;  %v619_v33 = vld [vmem:[#allocation7 + $0x248] sm:$0xff]  ;;  %v738_v61 = vld [vmem:[#allocation7 + $0x600] sm:$0xff] }
  0x52   :  { %487 = vmatpush.msrb.mxu0 %v132_v31  ;;  %v195_v31 = vld [vmem:[#allocation5 + $0x3a0] sm:$0xff] }
  0x53   :  { %512 = vmatpush.msra.mxu2 %v165_v37  ;;  %v786_v37 = vld [vmem:[#allocation7 + $0x780] sm:$0xff] }
  0x54   :  { %488 = vmatpush.msrb.mxu0 %v129_v35  ;;  %v626_v35 = vld [vmem:[#allocation7 + $0x280] sm:$0xff] }
  0x55   :  { %513 = vmatpush.msra.mxu2 %v162_v41  ;;  %v778_v41 = vld [vmem:[#allocation7 + $0x740] sm:$0xff] }
  0x56   :  { %489 = vmatpush.msrb.mxu0 %v126_v39  ;;  %v850_v39 = vld [vmem:[#allocation7 + $0x980] sm:$0xff] }
  0x57   :  { %514 = vmatpush.msra.mxu2 %v159_v45  ;;  %v770_v45 = vld [vmem:[#allocation7 + $0x700] sm:$0xff] }
  0x58   :  { %490 = vmatpush.msrb.mxu0 %v123_v43  ;;  %v842_v43 = vld [vmem:[#allocation7 + $0x940] sm:$0xff] }
  0x59   :  { %515 = vmatpush.msra.mxu2 %v156_v48  ;;  %v587_v48 = vld [vmem:[#allocation7 + $0x148] sm:$0xff] }
  0x5a   :  { %491 = vmatpush.msrb.mxu0 %v120_v46  ;;  %v602_v46 = vld [vmem:[#allocation7 + $0x1c0] sm:$0xff] }
  0x5b   :  { %516 = vmatpush.msra.mxu2 %v153_v51  ;;  %v826_v51 = vld [vmem:[#allocation7 + $0x8c0] sm:$0xff] }
  0x5c   :  { %492 = vmatpush.msrb.mxu0 %v117_v49  ;;  %v762_v49 = vld [vmem:[#allocation7 + $0x6c0] sm:$0xff] }
  0x5d   :  { %517 = vmatpush.msra.mxu2 %v150_v54  ;;  %v586_v54 = vld [vmem:[#allocation7 + $0x140] sm:$0xff] }
  0x5e   :  { %493 = vmatpush.msrb.mxu0 %v114_v52  ;;  %v579_v52 = vld [vmem:[#allocation7 + $0x108] sm:$0xff] }
  0x5f   :  { %518 = vmatpush.msra.mxu2 %v147_v57  ;;  %v746_v57 = vld [vmem:[#allocation7 + $0x640] sm:$0xff] }
  0x60   :  { %494 = vmatpush.msrb.mxu0 %v111_v55  ;;  %v818_v55 = vld [vmem:[#allocation7 + $0x880] sm:$0xff] }
  0x62   :  { %495 = vmatpush.msrb.mxu0 %v108_v58  ;;  %v578_v58 = vld [vmem:[#allocation7 + $0x100] sm:$0xff] }
  0x64   :  { %496 = vmatpush.msrb.mxu0 %v105_v60  ;;  %v563_v60 = vld [vmem:[#allocation7 + $0x88] sm:$0xff] }
  0x66   :  { %497 = vmatpush.msrb.mxu0 %v102_v62  ;;  %v570_v62 = vld [vmem:[#allocation7 + $0xc0] sm:$0xff] }
  0x68   :  { %498 = vmatpush.msrb.mxu0 %v99_v63  ;;  %v802_v63 = vld [vmem:[#allocation7 + $0x800] sm:$0xff] }
  0x9c   :  { %v306_v2 = vpop.f32.mrf.mxu0 }
  0x9d   :  { %v307_v3 = vadd.f32 %v306_v2, %v269_v1  ;;  %v730_v1 = vld [vmem:[#allocation7 + $0x5c0] sm:$0xff] }
  0x9e   :  { %v562_v2 = vld [vmem:[#allocation7 + $0x80] sm:$0xff] }
  0x9f   :  { %v2173_v4 = vmax.f32 %v307_v3, 0.0  ;;  %v795_v3 = vld [vmem:[#allocation7 + $0x7c8] sm:$0xff] }
  0xa1   :  { %379 = vmatmul.f32.vlgmr.msra.gmra.mxu3 %v2173_v4  ;;  %439 = vmatmul.f32.vlgmr.msrb.gmra.mxu2 %v2173_v4 }
  0xa2   :  { %531 = vmatpush.msra.mxu3 %v216_v6  ;;  %929 = vmatpush.msrb.mxu2 %v667_v7  ;;  %v554_v6 = vld [vmem:[#allocation7 + $0x40] sm:$0xff]  ;;  %v787_v7 = vld [vmem:[#allocation7 + $0x788] sm:$0xff] }
  0xa3   :  { %v346_v10 = vpop.f32.mrf.mxu2 }
  0xa4   :  { %v347_v11 = vadd.f32 %v346_v10, %v271_v5  ;;  %532 = vmatpush.msra.mxu3 %v213_v8  ;;  %930 = vmatpush.msrb.mxu2 %v659_v9  ;;  %v722_v5 = vld [vmem:[#allocation7 + $0x580] sm:$0xff]  ;;  %v860_v8 = vld [vmem:[#allocation7 + $0x9d0] sm:$0xff] }
  0xa5   :  { %v714_v9 = vld [vmem:[#allocation7 + $0x540] sm:$0xff] }
  0xa6   :  { %v351_v15 = vmax.f32 %v347_v11, 0.0  ;;  %v326_v18 = vpop.f32.mrf.mxu0  ;;  %533 = vmatpush.msra.mxu3 %v210_v13  ;;  %931 = vmatpush.msrb.mxu2 %v651_v14  ;;  %v546_v10 = vld [vmem:[#allocation7] sm:$0xff]  ;;  %v779_v11 = vld [vmem:[#allocation7 + $0x748] sm:$0xff]  ;;  %v852_v14 = vld [vmem:[#allocation7 + $0x990] sm:$0xff] }
  0xa7   :  { %v327_v20 = vadd.f32 %v326_v18, %v270_v12  ;;  %v859_v12 = vld [vmem:[#allocation7 + $0x9c8] sm:$0xff]  ;;  %v706_v13 = vld [vmem:[#allocation7 + $0x500] sm:$0xff]  ;;  %v844_v18 = vld [vmem:[#allocation7 + $0x950] sm:$0xff] }
  0xa8   :  { %1836 = vmatmul.msk.f32.vlgmr.msra.gmra.mxu1 %vm359_vm2, %v351_v15  ;;  %534 = vmatpush.msra.mxu3 %v207_v16  ;;  %v851_v16 = vld [vmem:[#allocation7 + $0x988] sm:$0xff] }
  0xa9   :  { %869 = vmatpush.msra.mxu1 %v666_v17  ;;  %v350_v23 = vmax.f32 %v327_v20, 0.0  ;;  %1837 = vmatmul.msk.f32.vlgmr.msrb.gmra.mxu3 %vm359_vm2, %v351_v15  ;;  %v698_v17 = vld [vmem:[#allocation7 + $0x4c0] sm:$0xff]  ;;  %v843_v20 = vld [vmem:[#allocation7 + $0x948] sm:$0xff] }
  0xaa   :  { %932 = vmatpush.msrb.mxu2 %v643_v19  ;;  %535 = vmatpush.msra.mxu3 %v204_v21  ;;  %v763_v19 = vld [vmem:[#allocation7 + $0x6c8] sm:$0xff]  ;;  %v690_v21 = vld [vmem:[#allocation7 + $0x480] sm:$0xff] }
  0xab   :  { %870 = vmatpush.msra.mxu1 %v658_v22  ;;  %399 = vmatmul.f32.vlgmr.msra.gmra.mxu0 %v350_v23  ;;  %v682_v22 = vld [vmem:[#allocation7 + $0x440] sm:$0xff] }
  0xac   :  { %519 = vmatmul.f32.vlgmr.msra.gmra.mxu2 %v350_v23  ;;  %536 = vmatpush.msra.mxu3 %v201_v24  ;;  %v668_v24 = vld [vmem:[#allocation7 + $0x3d0] sm:$0xff] }
  0xad   :  { %871 = vmatpush.msra.mxu1 %v650_v25  ;;  %933 = vmatpush.msrb.mxu2 %v635_v26  ;;  %v660_v25 = vld [vmem:[#allocation7 + $0x390] sm:$0xff] }
  0xae   :  { %917 = vmatpush.msra.mxu0 %v858_v27  ;;  %537 = vmatpush.msra.mxu3 %v198_v28  ;;  %v652_v26 = vld [vmem:[#allocation7 + $0x350] sm:$0xff] }
  0xaf   :  { %872 = vmatpush.msra.mxu1 %v642_v29  ;;  %934 = vmatpush.msrb.mxu2 %v627_v30  ;;  %v644_v27 = vld [vmem:[#allocation7 + $0x310] sm:$0xff] }
  0xb0   :  { %459 = vmatmul.f32.vlgmr.msrb.gmra.mxu1 %v350_v23  ;;  %538 = vmatpush.msra.mxu3 %v195_v31  ;;  %v674_v23 = vld [vmem:[#allocation7 + $0x400] sm:$0xff]  ;;  %v636_v28 = vld [vmem:[#allocation7 + $0x2d0] sm:$0xff] }
  0xb1   :  { %873 = vmatpush.msra.mxu1 %v634_v32  ;;  %1838 = vmatmul.msk.f32.vlgmr.msra.gmra.mxu3 %vm359_vm2, %v351_v15  ;;  %v771_v15 = vld [vmem:[#allocation7 + $0x708] sm:$0xff]  ;;  %v628_v29 = vld [vmem:[#allocation7 + $0x290] sm:$0xff] }
  0xb2   :  { %935 = vmatpush.msrb.mxu2 %v619_v33  ;;  %889 = vmatpush.msrb.mxu3 %v794_v34  ;;  %v620_v30 = vld [vmem:[#allocation7 + $0x250] sm:$0xff]  ;;  %v755_v32 = vld [vmem:[#allocation7 + $0x688] sm:$0xff] }
  0xb3   :  { %874 = vmatpush.msra.mxu1 %v626_v35  ;;  %499 = vmatmul.f32.vlgmr.msrb.gmra.mxu0 %v2173_v4  ;;  %v547_v4 = vld [vmem:[#allocation7 + $0x8] sm:$0xff]  ;;  %v612_v31 = vld [vmem:[#allocation7 + $0x210] sm:$0xff] }
  0xb4   :  { %936 = vmatpush.msrb.mxu2 %v611_v36  ;;  %890 = vmatpush.msrb.mxu3 %v786_v37  ;;  %v604_v33 = vld [vmem:[#allocation7 + $0x1d0] sm:$0xff]  ;;  %v835_v34 = vld [vmem:[#allocation7 + $0x908] sm:$0xff] }
  0xb5   :  { %875 = vmatpush.msra.mxu1 %v618_v38  ;;  %918 = vmatpush.msra.mxu0 %v850_v39  ;;  %v836_v35 = vld [vmem:[#allocation7 + $0x910] sm:$0xff]  ;;  %v747_v36 = vld [vmem:[#allocation7 + $0x648] sm:$0xff] }
  0xb6   :  { %937 = vmatpush.msrb.mxu2 %v603_v40  ;;  %891 = vmatpush.msrb.mxu3 %v778_v41  ;;  %v596_v37 = vld [vmem:[#allocation7 + $0x190] sm:$0xff]  ;;  %v827_v38 = vld [vmem:[#allocation7 + $0x8c8] sm:$0xff] }
  0xb7   :  { %876 = vmatpush.msra.mxu1 %v610_v42  ;;  %919 = vmatpush.msra.mxu0 %v842_v43  ;;  %v828_v39 = vld [vmem:[#allocation7 + $0x8d0] sm:$0xff]  ;;  %v739_v40 = vld [vmem:[#allocation7 + $0x608] sm:$0xff] }
  0xb8   :  { %938 = vmatpush.msrb.mxu2 %v595_v44  ;;  %892 = vmatpush.msrb.mxu3 %v770_v45  ;;  %v588_v41 = vld [vmem:[#allocation7 + $0x150] sm:$0xff]  ;;  %v819_v42 = vld [vmem:[#allocation7 + $0x888] sm:$0xff] }
  0xb9   :  { %877 = vmatpush.msra.mxu1 %v602_v46  ;;  %920 = vmatpush.msra.mxu0 %v834_v47  ;;  %v820_v43 = vld [vmem:[#allocation7 + $0x890] sm:$0xff]  ;;  %v731_v44 = vld [vmem:[#allocation7 + $0x5c8] sm:$0xff] }
  0xba   :  { %939 = vmatpush.msrb.mxu2 %v587_v48  ;;  %893 = vmatpush.msrb.mxu3 %v762_v49  ;;  %v580_v45 = vld [vmem:[#allocation7 + $0x110] sm:$0xff]  ;;  %v811_v46 = vld [vmem:[#allocation7 + $0x848] sm:$0xff] }
  0xbb   :  { %878 = vmatpush.msra.mxu1 %v594_v50  ;;  %921 = vmatpush.msra.mxu0 %v826_v51  ;;  %v812_v47 = vld [vmem:[#allocation7 + $0x850] sm:$0xff]  ;;  %v723_v48 = vld [vmem:[#allocation7 + $0x588] sm:$0xff] }
  0xbc   :  { %940 = vmatpush.msrb.mxu2 %v579_v52  ;;  %894 = vmatpush.msrb.mxu3 %v754_v53  ;;  %v572_v49 = vld [vmem:[#allocation7 + $0xd0] sm:$0xff]  ;;  %v803_v50 = vld [vmem:[#allocation7 + $0x808] sm:$0xff] }
  0xbd   :  { %879 = vmatpush.msra.mxu1 %v586_v54  ;;  %922 = vmatpush.msra.mxu0 %v818_v55  ;;  %v804_v51 = vld [vmem:[#allocation7 + $0x810] sm:$0xff]  ;;  %v715_v52 = vld [vmem:[#allocation7 + $0x548] sm:$0xff] }
  0xbe   :  { %941 = vmatpush.msrb.mxu2 %v571_v56  ;;  %895 = vmatpush.msrb.mxu3 %v746_v57  ;;  %v564_v53 = vld [vmem:[#allocation7 + $0x90] sm:$0xff]  ;;  %v707_v54 = vld [vmem:[#allocation7 + $0x508] sm:$0xff] }
  0xbf   :  { %880 = vmatpush.msra.mxu1 %v578_v58  ;;  %923 = vmatpush.msra.mxu0 %v810_v59  ;;  %v556_v55 = vld [vmem:[#allocation7 + $0x50] sm:$0xff]  ;;  %v699_v56 = vld [vmem:[#allocation7 + $0x4c8] sm:$0xff] }
  0xc0   :  { %942 = vmatpush.msrb.mxu2 %v563_v60  ;;  %896 = vmatpush.msrb.mxu3 %v738_v61  ;;  %v548_v57 = vld [vmem:[#allocation7 + $0x10] sm:$0xff]  ;;  %v691_v58 = vld [vmem:[#allocation7 + $0x488] sm:$0xff] }
  0xc1   :  { %881 = vmatpush.msra.mxu1 %v570_v62  ;;  %924 = vmatpush.msra.mxu0 %v802_v63  ;;  %v683_v59 = vld [vmem:[#allocation7 + $0x448] sm:$0xff] }
  0xc2   :  { %943 = vmatpush.msrb.mxu2 %v555_v0  ;;  %897 = vmatpush.msrb.mxu3 %v730_v1  ;;  %v675_v60 = vld [vmem:[#allocation7 + $0x408] sm:$0xff] }
  0xc3   :  { %882 = vmatpush.msra.mxu1 %v562_v2  ;;  %949 = vmatpush.msrb.mxu0 %v795_v3  ;;  %v218_v61 = vld [vmem:[#allocation5 + $0x450] ss:$8 sm:$0x7] }
  0xc4   :  { %944 = vmatpush.msrb.mxu2 %v547_v4  ;;  %898 = vmatpush.msrb.mxu3 %v722_v5  ;;  %v353_v62 = vperm.slane %v218_v61, 0  ;;  %v354_v2 = vperm.slane %v218_v61, 1 }
  0xc5   :  { %883 = vmatpush.msra.mxu1 %v554_v6  ;;  %950 = vmatpush.msrb.mxu0 %v787_v7 }
  0xc6   :  { %1037 = vmatpush.msra.mxu2 %v860_v8  ;;  %899 = vmatpush.msrb.mxu3 %v714_v9 }
  0xc7   :  { %884 = vmatpush.msra.mxu1 %v546_v10  ;;  %951 = vmatpush.msrb.mxu0 %v779_v11 }
  0xc8   :  { %900 = vmatpush.msrb.mxu3 %v706_v13  ;;  %1038 = vmatpush.msra.mxu2 %v852_v14  ;;  %v797_v13 = vld [vmem:[#allocation7 + $0x7d8] sm:$0xff]  ;;  %v355_v14 = vperm.slane %v218_v61, 2  ;;  %v790_v61 = vld [vmem:[#allocation7 + $0x7a0] sm:$0xff] }
  0xc9   :  { %977 = vmatpush.msrb.mxu1 %v859_v12  ;;  %952 = vmatpush.msrb.mxu0 %v771_v15  ;;  %v796_v12 = vld [vmem:[#allocation7 + $0x7d0] sm:$0xff] }
  0xca   :  { %901 = vmatpush.msrb.mxu3 %v698_v17  ;;  %1039 = vmatpush.msra.mxu2 %v844_v18  ;;  %v789_v17 = vld [vmem:[#allocation7 + $0x798] sm:$0xff] }
  0xcb   :  { %978 = vmatpush.msrb.mxu1 %v851_v16  ;;  %953 = vmatpush.msrb.mxu0 %v763_v19  ;;  %v788_v16 = vld [vmem:[#allocation7 + $0x790] sm:$0xff] }
  0xcc   :  { %902 = vmatpush.msrb.mxu3 %v690_v21  ;;  %1040 = vmatpush.msra.mxu2 %v836_v35  ;;  %v780_v21 = vld [vmem:[#allocation7 + $0x750] sm:$0xff] }
  0xcd   :  { %979 = vmatpush.msrb.mxu1 %v843_v20  ;;  %954 = vmatpush.msrb.mxu0 %v755_v32  ;;  %v765_v32 = vld [vmem:[#allocation7 + $0x6d8] sm:$0xff]  ;;  %v756_v35 = vld [vmem:[#allocation7 + $0x690] sm:$0xff] }
  0xce   :  { %903 = vmatpush.msrb.mxu3 %v682_v22  ;;  %1041 = vmatpush.msra.mxu2 %v828_v39  ;;  %v781_v22 = vld [vmem:[#allocation7 + $0x758] sm:$0xff]  ;;  %v748_v39 = vld [vmem:[#allocation7 + $0x650] sm:$0xff] }
  0xcf   :  { %980 = vmatpush.msrb.mxu1 %v835_v34  ;;  %955 = vmatpush.msrb.mxu0 %v747_v36  ;;  %v757_v36 = vld [vmem:[#allocation7 + $0x698] sm:$0xff] }
  0xd0   :  { %904 = vmatpush.msrb.mxu3 %v674_v23  ;;  %1042 = vmatpush.msra.mxu2 %v820_v43  ;;  %v740_v43 = vld [vmem:[#allocation7 + $0x610] sm:$0xff] }
  0xd1   :  { %981 = vmatpush.msrb.mxu1 %v827_v38  ;;  %956 = vmatpush.msrb.mxu0 %v739_v40  ;;  %v837_v38 = vld [vmem:[#allocation7 + $0x918] sm:$0xff] }
  0xd2   :  { %989 = vmatpush.msra.mxu3 %v668_v24  ;;  %1043 = vmatpush.msra.mxu2 %v812_v47  ;;  %v861_v24 = vld [vmem:[#allocation7 + $0x9d8] sm:$0xff]  ;;  %v732_v47 = vld [vmem:[#allocation7 + $0x5d0] sm:$0xff] }
  0xd3   :  { %982 = vmatpush.msrb.mxu1 %v819_v42  ;;  %957 = vmatpush.msrb.mxu0 %v731_v44  ;;  %v749_v40 = vld [vmem:[#allocation7 + $0x658] sm:$0xff] }
  0xd4   :  { %990 = vmatpush.msra.mxu3 %v660_v25  ;;  %1044 = vmatpush.msra.mxu2 %v804_v51  ;;  %v829_v42 = vld [vmem:[#allocation7 + $0x8d8] sm:$0xff]  ;;  %v724_v51 = vld [vmem:[#allocation7 + $0x590] sm:$0xff] }
  0xd5   :  { %983 = vmatpush.msrb.mxu1 %v811_v46  ;;  %958 = vmatpush.msrb.mxu0 %v723_v48  ;;  %v741_v44 = vld [vmem:[#allocation7 + $0x618] sm:$0xff] }
  0xd6   :  { %991 = vmatpush.msra.mxu3 %v652_v26  ;;  %v772_v26 = vld [vmem:[#allocation7 + $0x710] sm:$0xff]  ;;  %v821_v46 = vld [vmem:[#allocation7 + $0x898] sm:$0xff] }
  0xd7   :  { %984 = vmatpush.msrb.mxu1 %v803_v50  ;;  %959 = vmatpush.msrb.mxu0 %v715_v52  ;;  %v733_v48 = vld [vmem:[#allocation7 + $0x5d8] sm:$0xff] }
  0xd8   :  { %992 = vmatpush.msra.mxu3 %v644_v27  ;;  %v773_v27 = vld [vmem:[#allocation7 + $0x718] sm:$0xff] }
  0xd9   :  { %960 = vmatpush.msrb.mxu0 %v707_v54  ;;  %v813_v50 = vld [vmem:[#allocation7 + $0x858] sm:$0xff] }
  0xda   :  { %993 = vmatpush.msra.mxu3 %v636_v28  ;;  %v725_v52 = vld [vmem:[#allocation7 + $0x598] sm:$0xff] }
  0xdb   :  { %961 = vmatpush.msrb.mxu0 %v699_v56  ;;  %v805_v54 = vld [vmem:[#allocation7 + $0x818] sm:$0xff] }
  0xdc   :  { %994 = vmatpush.msra.mxu3 %v628_v29  ;;  %v853_v29 = vld [vmem:[#allocation7 + $0x998] sm:$0xff] }
  0xdd   :  { %962 = vmatpush.msrb.mxu0 %v691_v58  ;;  %v717_v56 = vld [vmem:[#allocation7 + $0x558] sm:$0xff] }
  0xde   :  { %995 = vmatpush.msra.mxu3 %v620_v30  ;;  %v629_v58 = vld [vmem:[#allocation7 + $0x298] sm:$0xff] }
  0xdf   :  { %963 = vmatpush.msrb.mxu0 %v683_v59  ;;  %v708_v59 = vld [vmem:[#allocation7 + $0x510] sm:$0xff] }
  0xe0   :  { %996 = vmatpush.msra.mxu3 %v612_v31  ;;  %v764_v31 = vld [vmem:[#allocation7 + $0x6d0] sm:$0xff] }
  0xe1   :  { %964 = vmatpush.msrb.mxu0 %v675_v60  ;;  %v709_v60 = vld [vmem:[#allocation7 + $0x518] sm:$0xff] }
  0xe2   :  { %997 = vmatpush.msra.mxu3 %v604_v33  ;;  %v845_v33 = vld [vmem:[#allocation7 + $0x958] sm:$0xff] }
  0xe4   :  { %998 = vmatpush.msra.mxu3 %v596_v37  ;;  %v669_v37 = vld [vmem:[#allocation7 + $0x3d8] sm:$0xff] }
  0xe6   :  { %999 = vmatpush.msra.mxu3 %v588_v41  ;;  %v661_v41 = vld [vmem:[#allocation7 + $0x398] sm:$0xff] }
  0xe8   :  { %1000 = vmatpush.msra.mxu3 %v580_v45  ;;  %v653_v45 = vld [vmem:[#allocation7 + $0x358] sm:$0xff] }
  0xea   :  { %1001 = vmatpush.msra.mxu3 %v572_v49  ;;  %v645_v49 = vld [vmem:[#allocation7 + $0x318] sm:$0xff] }
  0xec   :  { %1002 = vmatpush.msra.mxu3 %v564_v53  ;;  %v637_v53 = vld [vmem:[#allocation7 + $0x2d8] sm:$0xff] }
  0xee   :  { %1003 = vmatpush.msra.mxu3 %v556_v55  ;;  %v716_v55 = vld [vmem:[#allocation7 + $0x550] sm:$0xff] }
  0xf0   :  { %1004 = vmatpush.msra.mxu3 %v548_v57  ;;  %v798_v57 = vld [vmem:[#allocation7 + $0x7e0] sm:$0xff] }
 0x124   :  { %v380_v63 = vpop.f32.mrf.mxu3  ;;  %v440_v3 = vpop.f32.mrf.mxu2 }
 0x125   :  { %v420_v0 = vpop.f32.mrf.mxu1  ;;  %v381_v1 = vadd.f32 %v380_v63, %v353_v62  ;;  %v441_v6 = vadd.f32 %v440_v3, %v354_v2  ;;  %v621_v62 = vld [vmem:[#allocation7 + $0x258] sm:$0xff]  ;;  %v700_v63 = vld [vmem:[#allocation7 + $0x4d0] sm:$0xff] }
 0x126   :  { %v613_v2 = vld [vmem:[#allocation7 + $0x218] sm:$0xff]  ;;  %v692_v3 = vld [vmem:[#allocation7 + $0x490] sm:$0xff] }
 0x128   :  { %v400_v4 = vpop.f32.mrf.mxu0 }
 0x129   :  { %v401_v5 = vadd.f32 %v400_v4, %v381_v1  ;;  %v782_v1 = vld [vmem:[#allocation7 + $0x760] sm:$0xff]  ;;  %v693_v4 = vld [vmem:[#allocation7 + $0x498] sm:$0xff] }
 0x12b   :  { %v421_v7 = vadd.f32 %v420_v0, %v401_v5  ;;  %v701_v0 = vld [vmem:[#allocation7 + $0x4d8] sm:$0xff]  ;;  %v774_v5 = vld [vmem:[#allocation7 + $0x720] sm:$0xff] }
 0x12c   :  { %v480_v9 = vpop.f32.mrf.mxu3 }
 0x12d   :  { %v460_v8 = vpop.f32.mrf.mxu1  ;;  %v2181_v10 = vmax.f32 %v421_v7, 0.0  ;;  %v684_v7 = vld [vmem:[#allocation7 + $0x450] sm:$0xff] }
 0x12e   :  { %v461_v11 = vadd.f32 %v460_v8, %v441_v6  ;;  %v605_v6 = vld [vmem:[#allocation7 + $0x1d8] sm:$0xff] }
 0x12f   :  { %2466 = vst [vmem:[#allocation15_spill] sm:$0xff] %v2181_v10  ;;  %885 = vmatmul.f32.vlgmr.msra.gmra.mxu1 %v2181_v10  ;;  %945 = vmatmul.f32.vlgmr.msrb.gmra.mxu2 %v2181_v10  ;;  %v520_v23 = vpop.f32.mrf.mxu2  ;;  %v685_v8 = vld [vmem:[#allocation7 + $0x458] sm:$0xff] }
 0x130   :  { %v481_v15 = vadd.f32 %v480_v9, %v461_v11  ;;  %1009 = vmatpush.msra.mxu1 %v796_v12  ;;  %1069 = vmatpush.msrb.mxu2 %v797_v13  ;;  %v500_v18 = vpop.f32.mrf.mxu0  ;;  %v766_v9 = vld [vmem:[#allocation7 + $0x6e0] sm:$0xff]  ;;  %v597_v11 = vld [vmem:[#allocation7 + $0x198] sm:$0xff]  ;;  %v676_v12 = vld [vmem:[#allocation7 + $0x410] sm:$0xff] }
 0x131   :  { %v501_v20 = vadd.f32 %v500_v18, %v355_v14  ;;  %v677_v13 = vld [vmem:[#allocation7 + $0x418] sm:$0xff]  ;;  %v758_v14 = vld [vmem:[#allocation7 + $0x6a0] sm:$0xff] }
 0x132   :  { %v2185_v19 = vmax.f32 %v481_v15, 0.0  ;;  %1010 = vmatpush.msra.mxu1 %v788_v16  ;;  %1070 = vmatpush.msrb.mxu2 %v789_v17  ;;  %v589_v15 = vld [vmem:[#allocation7 + $0x158] sm:$0xff]  ;;  %v670_v16 = vld [vmem:[#allocation7 + $0x3e0] sm:$0xff]  ;;  %v671_v17 = vld [vmem:[#allocation7 + $0x3e8] sm:$0xff] }
 0x133   :  { %v521_v25 = vadd.f32 %v520_v23, %v501_v20  ;;  %v750_v18 = vld [vmem:[#allocation7 + $0x660] sm:$0xff]  ;;  %v581_v20 = vld [vmem:[#allocation7 + $0x118] sm:$0xff] }
 0x134   :  { %905 = vmatmul.f32.vlgmr.msrb.gmra.mxu3 %v2185_v19  ;;  %1011 = vmatpush.msra.mxu1 %v780_v21  ;;  %v540_v28 = vpop.f32.mrf.mxu3  ;;  %v662_v21 = vld [vmem:[#allocation7 + $0x3a0] sm:$0xff] }
 0x135   :  { %1071 = vmatpush.msrb.mxu2 %v781_v22  ;;  %1097 = vmatpush.msrb.mxu3 %v861_v24  ;;  %v541_v30 = vadd.f32 %v540_v28, %v521_v25  ;;  %v663_v22 = vld [vmem:[#allocation7 + $0x3a8] sm:$0xff]  ;;  %v742_v23 = vld [vmem:[#allocation7 + $0x620] sm:$0xff]  ;;  %v573_v24 = vld [vmem:[#allocation7 + $0xd8] sm:$0xff] }
 0x136   :  { %1012 = vmatpush.msra.mxu1 %v772_v26  ;;  %v654_v25 = vld [vmem:[#allocation7 + $0x360] sm:$0xff]  ;;  %v655_v26 = vld [vmem:[#allocation7 + $0x368] sm:$0xff]  ;;  %v565_v28 = vld [vmem:[#allocation7 + $0x98] sm:$0xff] }
 0x137   :  { %1072 = vmatpush.msrb.mxu2 %v773_v27  ;;  %v2188_v34 = vmax.f32 %v541_v30, 0.0  ;;  %1098 = vmatpush.msrb.mxu3 %v853_v29  ;;  %v734_v27 = vld [vmem:[#allocation7 + $0x5e0] sm:$0xff]  ;;  %v647_v30 = vld [vmem:[#allocation7 + $0x328] sm:$0xff] }
 0x138   :  { %1013 = vmatpush.msra.mxu1 %v764_v31  ;;  %v646_v29 = vld [vmem:[#allocation7 + $0x320] sm:$0xff] }
 0x139   :  { %1073 = vmatpush.msrb.mxu2 %v765_v32  ;;  %1099 = vmatpush.msrb.mxu3 %v845_v33  ;;  %v726_v31 = vld [vmem:[#allocation7 + $0x5a0] sm:$0xff]  ;;  %v557_v32 = vld [vmem:[#allocation7 + $0x58] sm:$0xff] }
 0x13a   :  { %1839 = vmatmul.msk.f32.vlgmr.msra.gmra.mxu0 %vm359_vm2, %v2188_v34  ;;  %1014 = vmatpush.msra.mxu1 %v756_v35  ;;  %v638_v33 = vld [vmem:[#allocation7 + $0x2e0] sm:$0xff]  ;;  %v639_v35 = vld [vmem:[#allocation7 + $0x2e8] sm:$0xff] }
 0x13b   :  { %1074 = vmatpush.msrb.mxu2 %v757_v36  ;;  %1840 = vmatmul.msk.f32.vlgmr.msrb.gmra.mxu1 %vm359_vm2, %v2188_v34  ;;  %v718_v36 = vld [vmem:[#allocation7 + $0x560] sm:$0xff] }
 0x13c   :  { %1841 = vmatmul.msk.f32.vlgmr.msra.gmra.mxu2 %vm359_vm2, %v2188_v34  ;;  %1049 = vmatpush.msra.mxu0 %v669_v37  ;;  %v549_v37 = vld [vmem:[#allocation7 + $0x18] sm:$0xff] }
 0x13d   :  { %1100 = vmatpush.msrb.mxu3 %v837_v38  ;;  %1015 = vmatpush.msra.mxu1 %v748_v39  ;;  %v630_v38 = vld [vmem:[#allocation7 + $0x2a0] sm:$0xff]  ;;  %v631_v39 = vld [vmem:[#allocation7 + $0x2a8] sm:$0xff] }
 0x13e   :  { %1075 = vmatpush.msrb.mxu2 %v749_v40  ;;  %1005 = vmatmul.f32.vlgmr.msra.gmra.mxu3 %v2181_v10  ;;  %v710_v40 = vld [vmem:[#allocation7 + $0x520] sm:$0xff] }
 0x13f   :  { %1050 = vmatpush.msra.mxu0 %v661_v41  ;;  %1101 = vmatpush.msrb.mxu3 %v829_v42  ;;  %v862_v41 = vld [vmem:[#allocation7 + $0x9e0] sm:$0xff] }
 0x140   :  { %1016 = vmatpush.msra.mxu1 %v740_v43  ;;  %1076 = vmatpush.msrb.mxu2 %v741_v44  ;;  %v622_v42 = vld [vmem:[#allocation7 + $0x260] sm:$0xff]  ;;  %v623_v43 = vld [vmem:[#allocation7 + $0x268] sm:$0xff] }
 0x141   :  { %1051 = vmatpush.msra.mxu0 %v653_v45  ;;  %1102 = vmatpush.msrb.mxu3 %v821_v46  ;;  %v702_v44 = vld [vmem:[#allocation7 + $0x4e0] sm:$0xff] }
 0x142   :  { %1017 = vmatpush.msra.mxu1 %v732_v47  ;;  %1077 = vmatpush.msrb.mxu2 %v733_v48  ;;  %v854_v45 = vld [vmem:[#allocation7 + $0x9a0] sm:$0xff]  ;;  %v615_v47 = vld [vmem:[#allocation7 + $0x228] sm:$0xff] }
 0x143   :  { %1052 = vmatpush.msra.mxu0 %v645_v49  ;;  %1103 = vmatpush.msrb.mxu3 %v813_v50  ;;  %v614_v46 = vld [vmem:[#allocation7 + $0x220] sm:$0xff] }
 0x144   :  { %1018 = vmatpush.msra.mxu1 %v724_v51  ;;  %1078 = vmatpush.msrb.mxu2 %v725_v52  ;;  %v694_v48 = vld [vmem:[#allocation7 + $0x4a0] sm:$0xff]  ;;  %v607_v51 = vld [vmem:[#allocation7 + $0x1e8] sm:$0xff] }
 0x145   :  { %965 = vmatmul.f32.vlgmr.msrb.gmra.mxu0 %v2185_v19  ;;  %1104 = vmatpush.msrb.mxu3 %v805_v54  ;;  %v846_v49 = vld [vmem:[#allocation7 + $0x960] sm:$0xff] }
 0x146   :  { %1053 = vmatpush.msra.mxu0 %v637_v53  ;;  %1019 = vmatpush.msra.mxu1 %v716_v55  ;;  %v606_v50 = vld [vmem:[#allocation7 + $0x1e0] sm:$0xff]  ;;  %v599_v55 = vld [vmem:[#allocation7 + $0x1a8] sm:$0xff] }
 0x147   :  { %1079 = vmatpush.msrb.mxu2 %v717_v56  ;;  %1129 = vmatpush.msra.mxu3 %v798_v57  ;;  %v686_v52 = vld [vmem:[#allocation7 + $0x460] sm:$0xff] }
 0x148   :  { %1054 = vmatpush.msra.mxu0 %v629_v58  ;;  %1842 = vmatmul.msk.f32.vlgmr.msrb.gmra.mxu3 %vm359_vm2, %v2188_v34  ;;  %v838_v53 = vld [vmem:[#allocation7 + $0x920] sm:$0xff] }
 0x149   :  { %1020 = vmatpush.msra.mxu1 %v708_v59  ;;  %1080 = vmatpush.msrb.mxu2 %v709_v60  ;;  %v598_v54 = vld [vmem:[#allocation7 + $0x1a0] sm:$0xff]  ;;  %v258_v59 = vld [vmem:[#allocation8 + $0xf0] sm:$0xff]  ;;  %v259_v60 = vld [vmem:[#allocation8 + $0xf8] sm:$0xff] }
 0x14a   :  { %1130 = vmatpush.msra.mxu3 %v790_v61  ;;  %1055 = vmatpush.msra.mxu0 %v621_v62  ;;  %v678_v56 = vld [vmem:[#allocation7 + $0x420] sm:$0xff]  ;;  %v591_v61 = vld [vmem:[#allocation7 + $0x168] sm:$0xff]  ;;  %v672_v62 = vld [vmem:[#allocation7 + $0x3f0] sm:$0xff] }
 0x14b   :  { %1021 = vmatpush.msra.mxu1 %v700_v63  ;;  %1081 = vmatpush.msrb.mxu2 %v701_v0  ;;  %v830_v57 = vld [vmem:[#allocation7 + $0x8e0] sm:$0xff] }
 0x14c   :  { %1131 = vmatpush.msra.mxu3 %v782_v1  ;;  %1056 = vmatpush.msra.mxu0 %v613_v2  ;;  %v590_v58 = vld [vmem:[#allocation7 + $0x160] sm:$0xff]  ;;  %v583_v1 = vld [vmem:[#allocation7 + $0x128] sm:$0xff]  ;;  %v664_v2 = vld [vmem:[#allocation7 + $0x3b0] sm:$0xff] }
 0x14d   :  { %1022 = vmatpush.msra.mxu1 %v692_v3  ;;  %1082 = vmatpush.msrb.mxu2 %v693_v4  ;;  %v822_v63 = vld [vmem:[#allocation7 + $0x8a0] sm:$0xff]  ;;  %v1873_v3 = vpack.i.bf16 %v258_v59, %v259_v60  ;;  %v824_v59 = vld [vmem:[#allocation7 + $0x8b0] sm:$0xff]  ;;  %v735_v60 = vld [vmem:[#allocation7 + $0x5e8] sm:$0xff] }
 0x14e   :  { %1132 = vmatpush.msra.mxu3 %v774_v5  ;;  %1057 = vmatpush.msra.mxu0 %v605_v6  ;;  %v582_v0 = vld [vmem:[#allocation7 + $0x120] sm:$0xff]  ;;  %v575_v6 = vld [vmem:[#allocation7 + $0xe8] sm:$0xff] }
 0x14f   :  { %1023 = vmatpush.msra.mxu1 %v684_v7  ;;  %1083 = vmatpush.msrb.mxu2 %v685_v8  ;;  %v814_v4 = vld [vmem:[#allocation7 + $0x860] sm:$0xff]  ;;  %v2204_v7 = vld [vmem:[#allocation8 + $0x70] sm:$0xff] }
 0x150   :  { %1133 = vmatpush.msra.mxu3 %v766_v9  ;;  %1058 = vmatpush.msra.mxu0 %v597_v11  ;;  %v574_v5 = vld [vmem:[#allocation7 + $0xe0] sm:$0xff]  ;;  %v656_v9 = vld [vmem:[#allocation7 + $0x370] sm:$0xff] }
 0x151   :  { %1024 = vmatpush.msra.mxu1 %v676_v12  ;;  %1084 = vmatpush.msrb.mxu2 %v677_v13  ;;  %v256_v8 = vld [vmem:[#allocation8 + $0xe0] sm:$0xff]  ;;  %v567_v13 = vld [vmem:[#allocation7 + $0xa8] sm:$0xff] }
 0x152   :  { %1134 = vmatpush.msra.mxu3 %v758_v14  ;;  %1025 = vmatmul.f32.vlgmr.msra.gmra.mxu1 %v2185_v19  ;;  %v806_v11 = vld [vmem:[#allocation7 + $0x820] sm:$0xff]  ;;  %v799_v14 = vld [vmem:[#allocation7 + $0x7e8] sm:$0xff] }
 0x153   :  { %1059 = vmatpush.msra.mxu0 %v589_v15  ;;  %1085 = vmatmul.f32.vlgmr.msrb.gmra.mxu2 %v2185_v19  ;;  %v566_v12 = vld [vmem:[#allocation7 + $0xa0] sm:$0xff]  ;;  %v1883_v15 = vpack.i.bf16 %v2204_v7, %v256_v8  ;;  %v719_v8 = vld [vmem:[#allocation7 + $0x568] sm:$0xff] }
 0x154   :  { %1109 = vmatpush.msrb.mxu1 %v670_v16  ;;  %1169 = vmatpush.msra.mxu2 %v671_v17  ;;  %v648_v16 = vld [vmem:[#allocation7 + $0x330] sm:$0xff]  ;;  %v558_v17 = vld [vmem:[#allocation7 + $0x60] sm:$0xff] }
 0x155   :  { %1135 = vmatpush.msra.mxu3 %v750_v18  ;;  %1060 = vmatpush.msra.mxu0 %v581_v20  ;;  %v559_v18 = vld [vmem:[#allocation7 + $0x68] sm:$0xff]  ;;  %v2210_v20 = vld [vmem:[#allocation8 + $0x78] sm:$0xff] }
 0x156   :  { %1110 = vmatpush.msrb.mxu1 %v662_v21  ;;  %1170 = vmatpush.msra.mxu2 %v663_v22  ;;  %v257_v21 = vld [vmem:[#allocation8 + $0xe8] sm:$0xff] }
 0x157   :  { %1136 = vmatpush.msra.mxu3 %v742_v23  ;;  %1061 = vmatpush.msra.mxu0 %v573_v24  ;;  %v791_v22 = vld [vmem:[#allocation7 + $0x7a8] sm:$0xff]  ;;  %v640_v23 = vld [vmem:[#allocation7 + $0x2f0] sm:$0xff]  ;;  %v550_v24 = vld [vmem:[#allocation7 + $0x20] sm:$0xff] }
 0x158   :  { %1111 = vmatpush.msrb.mxu1 %v654_v25  ;;  %1171 = vmatpush.msra.mxu2 %v655_v26  ;;  %v551_v25 = vld [vmem:[#allocation7 + $0x28] sm:$0xff] }
 0x159   :  { %1137 = vmatpush.msra.mxu3 %v734_v27  ;;  %1062 = vmatpush.msra.mxu0 %v565_v28  ;;  %v783_v26 = vld [vmem:[#allocation7 + $0x768] sm:$0xff]  ;;  %v632_v27 = vld [vmem:[#allocation7 + $0x2b0] sm:$0xff]  ;;  %v1878_v28 = vpack.i.bf16 %v2210_v20, %v257_v21  ;;  %v793_v21 = vld [vmem:[#allocation7 + $0x7b8] sm:$0xff] }
 0x15a   :  { %1112 = vmatpush.msrb.mxu1 %v646_v29  ;;  %1172 = vmatpush.msra.mxu2 %v647_v30  ;;  %v863_v29 = vld [vmem:[#allocation7 + $0x9e8] sm:$0xff] }
 0x15b   :  { %1138 = vmatpush.msra.mxu3 %v726_v31  ;;  %1063 = vmatpush.msra.mxu0 %v557_v32  ;;  %v2214_v30 = vld [vmem:[#allocation8 + $0x68] sm:$0xff]  ;;  %v255_v31 = vld [vmem:[#allocation8 + $0xd8] sm:$0xff]  ;;  %v864_v32 = vld [vmem:[#allocation7 + $0x9f0] sm:$0xff] }
 0x15c   :  { %1113 = vmatpush.msrb.mxu1 %v638_v33  ;;  %1173 = vmatpush.msra.mxu2 %v639_v35  ;;  %v775_v33 = vld [vmem:[#allocation7 + $0x728] sm:$0xff]  ;;  %v624_v35 = vld [vmem:[#allocation7 + $0x270] sm:$0xff] }
 0x15d   :  { %1139 = vmatpush.msra.mxu3 %v718_v36  ;;  %1064 = vmatpush.msra.mxu0 %v549_v37  ;;  %v855_v36 = vld [vmem:[#allocation7 + $0x9a8] sm:$0xff]  ;;  %v856_v37 = vld [vmem:[#allocation7 + $0x9b0] sm:$0xff] }
 0x15e   :  { %1114 = vmatpush.msrb.mxu1 %v630_v38  ;;  %1174 = vmatpush.msra.mxu2 %v631_v39  ;;  %v767_v38 = vld [vmem:[#allocation7 + $0x6e8] sm:$0xff]  ;;  %v1888_v39 = vpack.i.bf16 %v2214_v30, %v255_v31 }
 0x15f   :  { %1065 = vmatmul.f32.vlgmr.msra.gmra.mxu0 %v2181_v10  ;;  %1140 = vmatpush.msra.mxu3 %v710_v40  ;;  %v616_v40 = vld [vmem:[#allocation7 + $0x230] sm:$0xff]  ;;  %v695_v31 = vld [vmem:[#allocation7 + $0x4a8] sm:$0xff] }
 0x160   :  { %1157 = vmatpush.msrb.mxu0 %v862_v41  ;;  %1115 = vmatpush.msrb.mxu1 %v622_v42  ;;  %v847_v41 = vld [vmem:[#allocation7 + $0x968] sm:$0xff]  ;;  %v848_v42 = vld [vmem:[#allocation7 + $0x970] sm:$0xff] }
 0x161   :  { %1175 = vmatpush.msra.mxu2 %v623_v43  ;;  %1141 = vmatpush.msra.mxu3 %v702_v44  ;;  %v2220_v43 = vld [vmem:[#allocation8 + $0x50] sm:$0xff]  ;;  %v2222_v44 = vld [vmem:[#allocation8 + $0xc0] sm:$0xff] }
 0x162   :  { %1158 = vmatpush.msrb.mxu0 %v854_v45  ;;  %1116 = vmatpush.msrb.mxu1 %v614_v46  ;;  %v759_v45 = vld [vmem:[#allocation7 + $0x6a8] sm:$0xff]  ;;  %v608_v46 = vld [vmem:[#allocation7 + $0x1f0] sm:$0xff] }
 0x163   :  { %1176 = vmatpush.msra.mxu2 %v615_v47  ;;  %1142 = vmatpush.msra.mxu3 %v694_v48  ;;  %v839_v47 = vld [vmem:[#allocation7 + $0x928] sm:$0xff]  ;;  %v840_v48 = vld [vmem:[#allocation7 + $0x930] sm:$0xff] }
 0x164   :  { %1159 = vmatpush.msrb.mxu0 %v846_v49  ;;  %1117 = vmatpush.msrb.mxu1 %v606_v50  ;;  %v751_v49 = vld [vmem:[#allocation7 + $0x668] sm:$0xff]  ;;  %v600_v50 = vld [vmem:[#allocation7 + $0x1b0] sm:$0xff] }
 0x165   :  { %1177 = vmatpush.msra.mxu2 %v607_v51  ;;  %1143 = vmatpush.msra.mxu3 %v686_v52  ;;  %v1903_v51 = vpack.i.bf16 %v2220_v43, %v2222_v44  ;;  %v831_v52 = vld [vmem:[#allocation7 + $0x8e8] sm:$0xff] }
 0x166   :  { %1160 = vmatpush.msrb.mxu0 %v838_v53  ;;  %1118 = vmatpush.msrb.mxu1 %v598_v54  ;;  %v2227_v53 = vld [vmem:[#allocation8 + $0x48] sm:$0xff]  ;;  %v2229_v54 = vld [vmem:[#allocation8 + $0xb8] sm:$0xff] }
 0x167   :  { %1178 = vmatpush.msra.mxu2 %v599_v55  ;;  %1144 = vmatpush.msra.mxu3 %v678_v56  ;;  %v832_v55 = vld [vmem:[#allocation7 + $0x8f0] sm:$0xff]  ;;  %v743_v56 = vld [vmem:[#allocation7 + $0x628] sm:$0xff] }
 0x168   :  { %1161 = vmatpush.msrb.mxu0 %v830_v57  ;;  %1119 = vmatpush.msrb.mxu1 %v590_v58  ;;  %v592_v57 = vld [vmem:[#allocation7 + $0x170] sm:$0xff]  ;;  %v823_v58 = vld [vmem:[#allocation7 + $0x8a8] sm:$0xff] }
 0x169   :  { %1145 = vmatmul.f32.vlgmr.msra.gmra.mxu3 %v2185_v19  ;;  %1179 = vmatpush.msra.mxu2 %v591_v61  ;;  %v1908_v61 = vpack.i.bf16 %v2227_v53, %v2229_v54 }
 0x16a   :  { %1229 = vmatpush.msrb.mxu3 %v672_v62  ;;  %1162 = vmatpush.msrb.mxu0 %v822_v63  ;;  %v584_v62 = vld [vmem:[#allocation7 + $0x130] sm:$0xff]  ;;  %v815_v63 = vld [vmem:[#allocation7 + $0x868] sm:$0xff] }
 0x16b   :  { %1120 = vmatpush.msrb.mxu1 %v582_v0  ;;  %1180 = vmatpush.msra.mxu2 %v583_v1  ;;  %v816_v0 = vld [vmem:[#allocation7 + $0x870] sm:$0xff]  ;;  %v727_v1 = vld [vmem:[#allocation7 + $0x5a8] sm:$0xff] }
 0x16c   :  { %1230 = vmatpush.msrb.mxu3 %v664_v2  ;;  %1874 = vrot.lane.b32.xlu0 %v1873_v3, %s2116_s8  ;;  %v576_v2 = vld [vmem:[#allocation7 + $0xf0] sm:$0xff]  ;;  %v2234_v3 = vld [vmem:[#allocation8 + $0x38] sm:$0xff] }
 0x16d   :  { %1163 = vmatpush.msrb.mxu0 %v814_v4  ;;  %1121 = vmatpush.msrb.mxu1 %v574_v5  ;;  %v2236_v4 = vld [vmem:[#allocation8 + $0xa8] sm:$0xff] }
 0x16e   :  { %1181 = vmatpush.msra.mxu2 %v575_v6  ;;  %1231 = vmatpush.msrb.mxu3 %v656_v9  ;;  %v807_v5 = vld [vmem:[#allocation7 + $0x828] sm:$0xff]  ;;  %v808_v6 = vld [vmem:[#allocation7 + $0x830] sm:$0xff] }
 0x16f   :  { %1164 = vmatpush.msrb.mxu0 %v806_v11  ;;  %1122 = vmatpush.msrb.mxu1 %v566_v12  ;;  %v568_v9 = vld [vmem:[#allocation7 + $0xb0] sm:$0xff]  ;;  %v1918_v12 = vpack.i.bf16 %v2234_v3, %v2236_v4 }
 0x170   :  { %1843 = vmatmul.msk.f32.vlgmr.msrb.gmra.mxu0 %vm359_vm2, %v2188_v34  ;;  %1182 = vmatpush.msra.mxu2 %v567_v13  ;;  %v800_v11 = vld [vmem:[#allocation7 + $0x7f0] sm:$0xff]  ;;  %v801_v13 = vld [vmem:[#allocation7 + $0x7f8] sm:$0xff] }
 0x171   :  { %1189 = vmatpush.msra.mxu0 %v799_v14  ;;  %1232 = vmatpush.msrb.mxu3 %v648_v16  ;;  %v711_v14 = vld [vmem:[#allocation7 + $0x528] sm:$0xff]  ;;  %v2245_v16 = vld [vmem:[#allocation8 + $0xa0] sm:$0xff] }
 0x172   :  { %1884 = vrot.lane.b32.xlu1 %v1883_v15, %s2116_s8  ;;  %1123 = vmatpush.msrb.mxu1 %v558_v17  ;;  %v2243_v15 = vld [vmem:[#allocation8 + $0x30] sm:$0xff] }
 0x173   :  { %1183 = vmatpush.msra.mxu2 %v559_v18  ;;  %1190 = vmatpush.msra.mxu0 %v791_v22  ;;  %v560_v17 = vld [vmem:[#allocation7 + $0x70] sm:$0xff]  ;;  %v703_v22 = vld [vmem:[#allocation7 + $0x4e8] sm:$0xff] }
 0x174   :  { %1233 = vmatpush.msrb.mxu3 %v640_v23  ;;  %1124 = vmatpush.msrb.mxu1 %v550_v24  ;;  %v792_v18 = vld [vmem:[#allocation7 + $0x7b0] sm:$0xff] }
 0x175   :  { %1184 = vmatpush.msra.mxu2 %v551_v25  ;;  %1191 = vmatpush.msra.mxu0 %v783_v26  ;;  %v552_v23 = vld [vmem:[#allocation7 + $0x30] sm:$0xff]  ;;  %v1923_v25 = vpack.i.bf16 %v2243_v15, %v2245_v16  ;;  %v2252_v26 = vld [vmem:[#allocation8 + $0x60] sm:$0xff] }
 0x176   :  { %1234 = vmatpush.msrb.mxu3 %v632_v27  ;;  %1879 = vrot.lane.b32.xlu0 %v1878_v28, %s2116_s8  ;;  %v784_v24 = vld [vmem:[#allocation7 + $0x770] sm:$0xff]  ;;  %v785_v28 = vld [vmem:[#allocation7 + $0x778] sm:$0xff] }
 0x177   :  { %1125 = vmatmul.f32.vlgmr.msrb.gmra.mxu1 %v2181_v10  ;;  %1185 = vmatmul.f32.vlgmr.msra.gmra.mxu2 %v2181_v10  ;;  %v2254_v27 = vld [vmem:[#allocation8 + $0xd0] sm:$0xff] }
 0x178   :  { %1217 = vmatpush.msra.mxu1 %v863_v29  ;;  %1277 = vmatpush.msrb.mxu2 %v864_v32  ;;  %v865_v29 = vld [vmem:[#allocation7 + $0x9f8] sm:$0xff]  ;;  %v776_v32 = vld [vmem:[#allocation7 + $0x730] sm:$0xff] }
 0x179   :  { %1192 = vmatpush.msra.mxu0 %v775_v33  ;;  %1235 = vmatpush.msrb.mxu3 %v624_v35  ;;  %v1893_v33 = vpack.i.bf16 %v2252_v26, %v2254_v27  ;;  %v2258_v35 = vld [vmem:[#allocation8 + $0x28] sm:$0xff] }
 0x17a   :  { %1218 = vmatpush.msra.mxu1 %v855_v36  ;;  %1278 = vmatpush.msrb.mxu2 %v856_v37  ;;  %v2260_v36 = vld [vmem:[#allocation8 + $0x90] sm:$0xff]  ;;  %v777_v37 = vld [vmem:[#allocation7 + $0x738] sm:$0xff] }
 0x17b   :  { %1193 = vmatpush.msra.mxu0 %v767_v38  ;;  %1236 = vmatpush.msrb.mxu3 %v616_v40  ;;  %v857_v38 = vld [vmem:[#allocation7 + $0x9b8] sm:$0xff]  ;;  %v768_v40 = vld [vmem:[#allocation7 + $0x6f0] sm:$0xff] }
 0x17c   :  { %1889 = vrot.lane.b32.xlu1 %v1888_v39, %s2116_s8  ;;  %1219 = vmatpush.msra.mxu1 %v847_v41  ;;  %v687_v39 = vld [vmem:[#allocation7 + $0x468] sm:$0xff]  ;;  %v769_v41 = vld [vmem:[#allocation7 + $0x6f8] sm:$0xff] }
 0x17d   :  { %1279 = vmatpush.msrb.mxu2 %v848_v42  ;;  %1194 = vmatpush.msra.mxu0 %v759_v45  ;;  %v1933_v42 = vpack.i.bf16 %v2260_v36, %v2258_v35  ;;  %v849_v45 = vld [vmem:[#allocation7 + $0x978] sm:$0xff] }
 0x17e   :  { %1237 = vmatpush.msrb.mxu3 %v608_v46  ;;  %1220 = vmatpush.msra.mxu1 %v839_v47  ;;  %v679_v46 = vld [vmem:[#allocation7 + $0x428] sm:$0xff]  ;;  %v760_v47 = vld [vmem:[#allocation7 + $0x6b0] sm:$0xff] }
 0x17f   :  { %1280 = vmatpush.msrb.mxu2 %v840_v48  ;;  %1195 = vmatpush.msra.mxu0 %v751_v49  ;;  %v2267_v48 = vld [vmem:[#allocation8 + $0x20] sm:$0xff]  ;;  %v2269_v49 = vld [vmem:[#allocation8 + $0x130] sm:$0xff] }
 0x180   :  { %1238 = vmatpush.msrb.mxu3 %v600_v50  ;;  %1904 = vrot.lane.b32.xlu0 %v1903_v51, %s2116_s8  ;;  %v761_v50 = vld [vmem:[#allocation7 + $0x6b8] sm:$0xff] }
 0x181   :  { %1221 = vmatpush.msra.mxu1 %v831_v52  ;;  %1281 = vmatpush.msrb.mxu2 %v832_v55  ;;  %v673_v51 = vld [vmem:[#allocation7 + $0x3f8] sm:$0xff] }
 0x182   :  { %1196 = vmatpush.msra.mxu0 %v743_v56  ;;  %1239 = vmatpush.msrb.mxu3 %v592_v57  ;;  %v841_v52 = vld [vmem:[#allocation7 + $0x938] sm:$0xff]  ;;  %v2274_v56 = vld [vmem:[#allocation8 + $0xc8] sm:$0xff]  ;;  %v752_v57 = vld [vmem:[#allocation7 + $0x670] sm:$0xff] }
 0x183   :  { %1222 = vmatpush.msra.mxu1 %v823_v58  ;;  %1282 = vmatpush.msrb.mxu2 %v824_v59  ;;  %v2272_v55 = vld [vmem:[#allocation8 + $0x58] sm:$0xff]  ;;  %v1938_v59 = vpack.i.bf16 %v2267_v48, %v2269_v49 }
 0x184   :  { %1197 = vmatpush.msra.mxu0 %v735_v60  ;;  %1240 = vmatpush.msrb.mxu3 %v584_v62  ;;  %v753_v58 = vld [vmem:[#allocation7 + $0x678] sm:$0xff]  ;;  %v744_v62 = vld [vmem:[#allocation7 + $0x630] sm:$0xff] }
 0x185   :  { %1909 = vrot.lane.b32.xlu1 %v1908_v61, %s2116_s8  ;;  %1223 = vmatpush.msra.mxu1 %v815_v63  ;;  %v665_v60 = vld [vmem:[#allocation7 + $0x3b8] sm:$0xff]  ;;  %v1898_v63 = vpack.i.bf16 %v2272_v55, %v2274_v56 }
 0x186   :  { %1283 = vmatpush.msrb.mxu2 %v816_v0  ;;  %1198 = vmatpush.msra.mxu0 %v727_v1  ;;  %v833_v61 = vld [vmem:[#allocation7 + $0x8f8] sm:$0xff]  ;;  %v2283_v1 = vld [vmem:[#allocation8 + $0x80] sm:$0xff] }
 0x187   :  { %1241 = vmatpush.msrb.mxu3 %v576_v2  ;;  %1224 = vmatpush.msra.mxu1 %v807_v5  ;;  %v2281_v0 = vld [vmem:[#allocation8 + $0x18] sm:$0xff] }
 0x188   :  { %1284 = vmatpush.msrb.mxu2 %v808_v6  ;;  %1199 = vmatpush.msra.mxu0 %v719_v8  ;;  %v745_v2 = vld [vmem:[#allocation7 + $0x638] sm:$0xff]  ;;  %v736_v8 = vld [vmem:[#allocation7 + $0x5f0] sm:$0xff] }
 0x189   :  { %1844 = vmatmul.msk.f32.vlgmr.msra.gmra.mxu1 %vm359_vm2, %v2188_v34  ;;  %1242 = vmatpush.msrb.mxu3 %v568_v9  ;;  %v657_v5 = vld [vmem:[#allocation7 + $0x378] sm:$0xff] }
 0x18a   :  { %1249 = vmatpush.msrb.mxu1 %v800_v11  ;;  %1845 = vmatmul.msk.f32.vlgmr.msrb.gmra.mxu2 %vm359_vm2, %v2188_v34  ;;  %v825_v6 = vld [vmem:[#allocation7 + $0x8b8] sm:$0xff]  ;;  %v1948_v11 = vpack.i.bf16 %v2283_v1, %v2281_v0 }
 0x18b   :  { %1919 = vrot.lane.b32.xlu0 %v1918_v12, %s2116_s8  ;;  %1309 = vmatpush.msra.mxu2 %v801_v13  ;;  %v737_v9 = vld [vmem:[#allocation7 + $0x5f8] sm:$0xff] }
 0x18c   :  { %1200 = vmatpush.msra.mxu0 %v711_v14  ;;  %1243 = vmatpush.msrb.mxu3 %v560_v17  ;;  %v649_v12 = vld [vmem:[#allocation7 + $0x338] sm:$0xff]  ;;  %v728_v14 = vld [vmem:[#allocation7 + $0x5b0] sm:$0xff] }
 0x18d   :  { %1250 = vmatpush.msrb.mxu1 %v792_v18  ;;  %1310 = vmatpush.msra.mxu2 %v793_v21  ;;  %v817_v13 = vld [vmem:[#allocation7 + $0x878] sm:$0xff]  ;;  %v2289_v17 = vld [vmem:[#allocation8 + $0x10] sm:$0xff]  ;;  %v2291_v18 = vld [vmem:[#allocation8 + $0x120] sm:$0xff] }
 0x18e   :  { %1201 = vmatpush.msra.mxu0 %v703_v22  ;;  %1244 = vmatpush.msrb.mxu3 %v552_v23  ;;  %v729_v21 = vld [vmem:[#allocation7 + $0x5b8] sm:$0xff] }
 0x18f   :  { %1251 = vmatpush.msrb.mxu1 %v784_v24  ;;  %1311 = vmatpush.msra.mxu2 %v785_v28  ;;  %v641_v22 = vld [vmem:[#allocation7 + $0x2f8] sm:$0xff]  ;;  %v720_v24 = vld [vmem:[#allocation7 + $0x570] sm:$0xff] }
 0x190   :  { %1924 = vrot.lane.b32.xlu1 %v1923_v25, %s2116_s8  ;;  %1245 = vmatmul.f32.vlgmr.msrb.gmra.mxu3 %v2181_v10  ;;  %v809_v23 = vld [vmem:[#allocation7 + $0x838] sm:$0xff]  ;;  %v2294_v25 = vld [vmem:[#allocation8 + $0x40] sm:$0xff]  ;;  %v2296_v28 = vld [vmem:[#allocation8 + $0xb0] sm:$0xff] }
 0x191   :  { %1202 = vmatpush.msra.mxu0 %v695_v31  ;;  %1337 = vmatpush.msra.mxu3 %v865_v29  ;;  %v721_v29 = vld [vmem:[#allocation7 + $0x578] sm:$0xff]  ;;  %v1953_v31 = vpack.i.bf16 %v2289_v17, %v2291_v18 }
 0x192   :  { %1252 = vmatpush.msrb.mxu1 %v776_v32  ;;  %1312 = vmatpush.msra.mxu2 %v777_v37  ;;  %v633_v32 = vld [vmem:[#allocation7 + $0x2b8] sm:$0xff]  ;;  %v2302_v37 = vld [vmem:[#allocation8 + $0x110] sm:$0xff] }
 0x193   :  { %1894 = vrot.lane.b32.xlu2 %v1893_v33, %s2116_s8  ;;  %1338 = vmatpush.msra.mxu3 %v857_v38  ;;  %v2300_v33 = vld [vmem:[#allocation8] sm:$0xff]  ;;  %v712_v38 = vld [vmem:[#allocation7 + $0x530] sm:$0xff] }
 0x194   :  { %1203 = vmatpush.msra.mxu0 %v687_v39  ;;  %1253 = vmatpush.msrb.mxu1 %v768_v40  ;;  %v713_v39 = vld [vmem:[#allocation7 + $0x538] sm:$0xff]  ;;  %v1913_v40 = vpack.i.bf16 %v2294_v25, %v2296_v28 }
 0x195   :  { %1313 = vmatpush.msra.mxu2 %v769_v41  ;;  %1934 = vrot.lane.b32.xlu0 %v1933_v42, %s2116_s8  ;;  %v625_v41 = vld [vmem:[#allocation7 + $0x278] sm:$0xff]  ;;  %v704_v42 = vld [vmem:[#allocation7 + $0x4f0] sm:$0xff] }
 0x196   :  { %1339 = vmatpush.msra.mxu3 %v849_v45  ;;  %1204 = vmatpush.msra.mxu0 %v679_v46  ;;  %v705_v45 = vld [vmem:[#allocation7 + $0x4f8] sm:$0xff]  ;;  %v1963_v46 = vpack.i.bf16 %v2300_v33, %v2302_v37 }
 0x197   :  { %1254 = vmatpush.msrb.mxu1 %v760_v47  ;;  %1314 = vmatpush.msra.mxu2 %v761_v50  ;;  %v617_v47 = vld [vmem:[#allocation7 + $0x238] sm:$0xff]  ;;  %v2311_v50 = vld [vmem:[#allocation8 + $0x100] sm:$0xff] }
 0x198   :  { %1205 = vmatmul.f32.vlgmr.msra.gmra.mxu0 %v2185_v19  ;;  %1340 = vmatpush.msra.mxu3 %v841_v52  ;;  %v697_v52 = vld [vmem:[#allocation7 + $0x4b8] sm:$0xff] }
 0x199   :  { %1289 = vmatpush.msrb.mxu0 %v673_v51  ;;  %1255 = vmatpush.msrb.mxu1 %v752_v57  ;;  %v2313_v51 = vld [vmem:[#allocation8 + $0x108] sm:$0xff]  ;;  %v609_v57 = vld [vmem:[#allocation7 + $0x1f8] sm:$0xff] }
 0x19a   :  { %1315 = vmatpush.msra.mxu2 %v753_v58  ;;  %1939 = vrot.lane.b32.xlu1 %v1938_v59, %s2116_s8  ;;  %v2316_v58 = vld [vmem:[#allocation8 + $0x98] sm:$0xff] }
 0x19b   :  { %1290 = vmatpush.msrb.mxu0 %v665_v60  ;;  %1341 = vmatpush.msra.mxu3 %v833_v61  ;;  %v2318_v59 = vld [vmem:[#allocation8 + $0x138] sm:$0xff]  ;;  %v688_v60 = vld [vmem:[#allocation7 + $0x470] sm:$0xff] }
 0x19c   :  { %1256 = vmatpush.msrb.mxu1 %v744_v62  ;;  %1316 = vmatpush.msra.mxu2 %v745_v2  ;;  %v689_v61 = vld [vmem:[#allocation7 + $0x478] sm:$0xff]  ;;  %v1968_v62 = vpack.i.bf16 %v2311_v50, %v2313_v51  ;;  %v680_v2 = vld [vmem:[#allocation7 + $0x430] sm:$0xff] }
 0x19d   :  { %1899 = vrot.lane.b32.xlu2 %v1898_v63, %s2116_s8  ;;  %1291 = vmatpush.msrb.mxu0 %v657_v5  ;;  %v601_v63 = vld [vmem:[#allocation7 + $0x1b8] sm:$0xff] }
 0x19e   :  { %1342 = vmatpush.msra.mxu3 %v825_v6  ;;  %1257 = vmatpush.msrb.mxu1 %v736_v8  ;;  %v681_v5 = vld [vmem:[#allocation7 + $0x438] sm:$0xff]  ;;  %v1928_v6 = vpack.i.bf16 %v2318_v59, %v2316_v58 }
 0x19f   :  { %1317 = vmatpush.msra.mxu2 %v737_v9  ;;  %1949 = vrot.lane.b32.xlu0 %v1948_v11, %s2116_s8  ;;  %v593_v8 = vld [vmem:[#allocation7 + $0x178] sm:$0xff]  ;;  %v2329_v11 = vld [vmem:[#allocation8 + $0x88] sm:$0xff] }
 0x1a0   :  { %1292 = vmatpush.msrb.mxu0 %v649_v12  ;;  %1343 = vmatpush.msra.mxu3 %v817_v13  ;;  %v585_v9 = vld [vmem:[#allocation7 + $0x138] sm:$0xff]  ;;  %v2331_v12 = vld [vmem:[#allocation8 + $0x128] sm:$0xff] }
 0x1a1   :  { %1258 = vmatpush.msrb.mxu1 %v728_v14  ;;  %1318 = vmatpush.msra.mxu2 %v729_v21  ;;  %v577_v13 = vld [vmem:[#allocation7 + $0xf8] sm:$0xff]  ;;  %v1943_v21 = vpack.i.bf16 %v2331_v12, %v2329_v11 }
 0x1a2   :  { %1293 = vmatpush.msrb.mxu0 %v641_v22  ;;  %1344 = vmatpush.msra.mxu3 %v809_v23  ;;  %v569_v14 = vld [vmem:[#allocation7 + $0xb8] sm:$0xff] }
 0x1a3   :  { %1259 = vmatpush.msrb.mxu1 %v720_v24  ;;  %1319 = vmatpush.msra.mxu2 %v721_v29  ;;  %v561_v22 = vld [vmem:[#allocation7 + $0x78] sm:$0xff]  ;;  %v2336_v24 = vld [vmem:[#allocation8 + $0x8] sm:$0xff] }
 0x1a4   :  { %1846 = vmatmul.msk.f32.vlgmr.msra.gmra.mxu3 %vm359_vm2, %v2188_v34  ;;  %1954 = vrot.lane.b32.xlu1 %v1953_v31, %s2116_s8  ;;  %v696_v34 = vld [vmem:[#allocation7 + $0x4b0] sm:$0xff]  ;;  %v553_v23 = vld [vmem:[#allocation7 + $0x38] sm:$0xff] }
 0x1a5   :  { %1294 = vmatpush.msrb.mxu0 %v633_v32  ;;  %1260 = vmatpush.msrb.mxu1 %v712_v38 }
 0x1a6   :  { %1320 = vmatpush.msra.mxu2 %v713_v39  ;;  %1914 = vrot.lane.b32.xlu2 %v1913_v40, %s2116_s8 }
 0x1a7   :  { %1295 = vmatpush.msrb.mxu0 %v625_v41  ;;  %1261 = vmatpush.msrb.mxu1 %v704_v42 }
 0x1a8   :  { %1321 = vmatpush.msra.mxu2 %v705_v45  ;;  %1964 = vrot.lane.b32.xlu0 %v1963_v46, %s2116_s8 }
 0x1a9   :  { %1296 = vmatpush.msrb.mxu0 %v617_v47  ;;  %1262 = vmatpush.msrb.mxu1 %v696_v34 }
 0x1aa   :  { %1322 = vmatpush.msra.mxu2 %v697_v52 }
 0x1ab   :  { %1297 = vmatpush.msrb.mxu0 %v609_v57  ;;  %1263 = vmatpush.msrb.mxu1 %v688_v60 }
 0x1ac   :  { %1323 = vmatpush.msra.mxu2 %v689_v61  ;;  %1969 = vrot.lane.b32.xlu1 %v1968_v62, %s2116_s8  ;;  %v2356_v42 = vpop.f32.mrf.mxu1 }
 0x1ad   :  { %1298 = vmatpush.msrb.mxu0 %v601_v63  ;;  %1264 = vmatpush.msrb.mxu1 %v680_v2 }
 0x1ae   :  { %1324 = vmatpush.msra.mxu2 %v681_v5  ;;  %1929 = vrot.lane.b32.xlu2 %v1928_v6, %s2116_s8 }
 0x1af   :  { %1265 = vmatmul.f32.vlgmr.msrb.gmra.mxu1 %v2185_v19  ;;  %1299 = vmatpush.msrb.mxu0 %v593_v8 }
 0x1b0   :  { %1325 = vmatmul.f32.vlgmr.msra.gmra.mxu2 %v2185_v19  ;;  %v2338_v19 = vld [vmem:[#allocation8 + $0x118] sm:$0xff] }
 0x1b1   :  { %1300 = vmatpush.msrb.mxu0 %v585_v9  ;;  %v1958_v29 = vpack.i.bf16 %v2336_v24, %v2338_v19 }
 0x1b2   :  { %v2348_v38 = vpop.f32.mrf.mxu2 }
 0x1b3   :  { %1301 = vmatpush.msrb.mxu0 %v577_v13 }
 0x1b5   :  { %1302 = vmatpush.msrb.mxu0 %v569_v14 }
 0x1b6   :  { %1944 = vrot.lane.b32.xlu2 %v1943_v21, %s2116_s8 }
 0x1b7   :  { %1303 = vmatpush.msrb.mxu0 %v561_v22  ;;  %v2344_v31 = vpop.f32.mrf.mxu3  ;;  %v2346_v32 = vpop.f32.mrf.mxu0 }
 0x1b8   :  { %v2360_v62 = vpop.f32.mrf.mxu1 }
 0x1b9   :  { %1304 = vmatpush.msrb.mxu0 %v553_v23 }
 0x1ba   :  { %1305 = vmatmul.f32.vlgmr.msrb.gmra.mxu0 %v2181_v10 }
 0x1be   :  { %1959 = vrot.lane.b32.xlu2 %v1958_v29, %s2116_s8 }
 0x1bf   :  { %v2350_v39 = vpop.f32.mrf.mxu2 }
 0x1c1   :  { %v2354_v41 = vpop.f32.mrf.mxu3 }
 0x1c2   :  { %v2352_v40 = vpop.f32.mrf.mxu0 }
 0x1cb   :  { %v1106_v34 = vpop.f32.mrf.mxu3 }
 0x1cf   :  { %v2362_v13 = vpop.f32.mrf.mxu1 }
 0x1d6   :  { %v1086_v45 = vpop.f32.mrf.mxu2 }
 0x1dc   :  { %v1066_v46 = vpop.f32.mrf.mxu0 }
 0x1dd   :  { %v1087_v47 = vadd.f32 %v1086_v45, %v1066_v46 }
 0x1de   :  { %v1875_v52 = vpop.permute.xlu0 %1874 }
 0x1df   :  { %v2358_v57 = vadd.f32 %v1106_v34, %v1087_v47  ;;  %v1877_v60 = vunpack.i.h.bf16 %v1875_v52  ;;  %v1876_v61 = vunpack.i.l.bf16 %v1875_v52 }
 0x1e1   :  { %1535 = vmatpush.msrb.mxu3 %v1876_v61 }
 0x1e3   :  { %1536 = vmatpush.msrb.mxu3 %v1877_v60 }
 0x1e4   :  { %v1885_v63 = vpop.permute.xlu1 %1884 }
 0x1e5   :  { %v1887_v5 = vunpack.i.h.bf16 %v1885_v63  ;;  %v1886_v6 = vunpack.i.l.bf16 %v1885_v63 }
 0x1e8   :  { %v1880_v2 = vpop.permute.xlu0 %1879 }
 0x1e9   :  { %v1882_v8 = vunpack.i.h.bf16 %v1880_v2  ;;  %v1881_v9 = vunpack.i.l.bf16 %v1880_v2 }
 0x1eb   :  { %1515 = vmatpush.msra.mxu1 %v1882_v8  ;;  %1537 = vmatpush.msrb.mxu3 %v1881_v9 }
 0x1ec   :  { %v1146_v46 = vpop.f32.mrf.mxu3 }
 0x1ed   :  { %v1895_v14 = vpop.permute.xlu2 %1894  ;;  %1516 = vmatpush.msra.mxu1 %v1887_v5  ;;  %1538 = vmatpush.msrb.mxu3 %v1886_v6  ;;  %v1166_v60 = vpop.f32.mrf.mxu0 }
 0x1ee   :  { %v1890_v21 = vpop.permute.xlu1 %1889  ;;  %v1897_v22 = vunpack.i.h.bf16 %v1895_v14  ;;  %v1896_v23 = vunpack.i.l.bf16 %v1895_v14 }
 0x1ef   :  { %v1892_v29 = vunpack.i.h.bf16 %v1890_v21  ;;  %v1891_v45 = vunpack.i.l.bf16 %v1890_v21 }
 0x1f1   :  { %1517 = vmatpush.msra.mxu1 %v1892_v29  ;;  %1539 = vmatpush.msrb.mxu3 %v1891_v45 }
 0x1f2   :  { %v1905_v47 = vpop.permute.xlu0 %1904 }
 0x1f3   :  { %1518 = vmatpush.msra.mxu1 %v1897_v22  ;;  %1540 = vmatpush.msrb.mxu3 %v1896_v23  ;;  %v1907_v5 = vunpack.i.h.bf16 %v1905_v47  ;;  %v1906_v6 = vunpack.i.l.bf16 %v1905_v47 }
 0x1f4   :  { %v1126_v34 = vpop.f32.mrf.mxu1 }
 0x1f5   :  { %v1147_v52 = vadd.f32 %v1146_v46, %v1126_v34 }
 0x1f7   :  { %v1900_v61 = vpop.permute.xlu2 %1899  ;;  %v2364_v63 = vadd.f32 %v1166_v60, %v1147_v52  ;;  %v1910_v9 = vpop.permute.xlu1 %1909 }
 0x1f8   :  { %v1902_v2 = vunpack.i.h.bf16 %v1900_v61  ;;  %v1901_v8 = vunpack.i.l.bf16 %v1900_v61  ;;  %v1912_v14 = vunpack.i.h.bf16 %v1910_v9  ;;  %v1911_v10 = vunpack.i.l.bf16 %v1910_v9 }
 0x1fa   :  { %1519 = vmatpush.msra.mxu1 %v1902_v2  ;;  %1541 = vmatpush.msrb.mxu3 %v1901_v8 }
 0x1fc   :  { %1520 = vmatpush.msra.mxu1 %v1907_v5  ;;  %1542 = vmatpush.msrb.mxu3 %v1906_v6 }
 0x1fd   :  { %v1920_v21 = vpop.permute.xlu0 %1919 }
 0x1fe   :  { %1521 = vmatpush.msra.mxu1 %v1912_v14  ;;  %1543 = vmatpush.msrb.mxu3 %v1911_v10  ;;  %v1922_v45 = vunpack.i.h.bf16 %v1920_v21  ;;  %v1921_v46 = vunpack.i.l.bf16 %v1920_v21 }
 0x200   :  { %v1915_v22 = vpop.permute.xlu2 %1914 }
 0x201   :  { %v1917_v23 = vunpack.i.h.bf16 %v1915_v22  ;;  %v1916_v29 = vunpack.i.l.bf16 %v1915_v22 }
 0x202   :  { %v1925_v34 = vpop.permute.xlu1 %1924 }
 0x203   :  { %v1927_v52 = vunpack.i.h.bf16 %v1925_v34  ;;  %v1926_v60 = vunpack.i.l.bf16 %v1925_v34  ;;  %1522 = vmatpush.msra.mxu1 %v1917_v23  ;;  %1544 = vmatpush.msrb.mxu3 %v1916_v29  ;;  %v907_v34 = vadd.f32 %v2344_v31, %v2356_v42 }
 0x205   :  { %1523 = vmatpush.msra.mxu1 %v1922_v45  ;;  %1545 = vmatpush.msrb.mxu3 %v1921_v46 }
 0x207   :  { %v1935_v47 = vpop.permute.xlu0 %1934  ;;  %1524 = vmatpush.msra.mxu1 %v1927_v52  ;;  %1546 = vmatpush.msrb.mxu3 %v1926_v60  ;;  %v1186_v52 = vpop.f32.mrf.mxu2 }
 0x208   :  { %v1930_v61 = vpop.permute.xlu2 %1929  ;;  %v1936_v2 = vunpack.i.l.bf16 %v1935_v47  ;;  %v1937_v10 = vunpack.i.h.bf16 %v1935_v47 }
 0x209   :  { %v1932_v8 = vunpack.i.h.bf16 %v1930_v61  ;;  %v1931_v5 = vunpack.i.l.bf16 %v1930_v61  ;;  %v1226_v61 = vpop.f32.mrf.mxu1 }
 0x20a   :  { %1525 = vmatpush.msra.mxu1 %v1936_v2 }
 0x20b   :  { %1547 = vmatpush.msrb.mxu3 %v1931_v5  ;;  %1563 = vmatpush.msra.mxu0 %v1932_v8 }
 0x20c   :  { %v1940_v6 = vpop.permute.xlu1 %1939 }
 0x20d   :  { %v1942_v9 = vunpack.i.h.bf16 %v1940_v6  ;;  %v1941_v14 = vunpack.i.l.bf16 %v1940_v6  ;;  %1548 = vmatpush.msrb.mxu3 %v1937_v10  ;;  %v927_v6 = vadd.f32 %v2346_v32, %v907_v34 }
 0x20f   :  { %1526 = vmatpush.msra.mxu1 %v1942_v9  ;;  %1564 = vmatpush.msra.mxu0 %v1941_v14 }
 0x210   :  { %v1945_v21 = vpop.permute.xlu2 %1944 }
 0x211   :  { %v1947_v22 = vunpack.i.h.bf16 %v1945_v21  ;;  %v1946_v23 = vunpack.i.l.bf16 %v1945_v21  ;;  %v1950_v29 = vpop.permute.xlu0 %1949 }
 0x212   :  { %v1952_v45 = vunpack.i.h.bf16 %v1950_v29  ;;  %v1951_v46 = vunpack.i.l.bf16 %v1950_v29 }
 0x213   :  { %1549 = vmatpush.msrb.mxu3 %v1946_v23  ;;  %1565 = vmatpush.msra.mxu0 %v1947_v22 }
 0x214   :  { %1527 = vmatpush.msra.mxu1 %v1951_v46 }
 0x215   :  { %v1206_v60 = vpop.f32.mrf.mxu0  ;;  %1550 = vmatpush.msrb.mxu3 %v1952_v45 }
 0x216   :  { %v1207_v47 = vadd.f32 %v1206_v60, %v1186_v52  ;;  %v1955_v2 = vpop.permute.xlu1 %1954 }
 0x217   :  { %1797 = vmatpush.msra.mxu3 %v2318_v59  ;;  %v1957_v8 = vunpack.i.h.bf16 %v1955_v2  ;;  %v1956_v5 = vunpack.i.l.bf16 %v1955_v2 }
 0x218   :  { %v1227_v10 = vadd.f32 %v1226_v61, %v1207_v47  ;;  %v1960_v9 = vpop.permute.xlu2 %1959 }
 0x219   :  { %1798 = vmatpush.msra.mxu3 %v2269_v49  ;;  %v1962_v14 = vunpack.i.h.bf16 %v1960_v9  ;;  %v1961_v21 = vunpack.i.l.bf16 %v1960_v9  ;;  %1528 = vmatpush.msra.mxu1 %v1957_v8 }
 0x21a   :  { %1566 = vmatpush.msra.mxu0 %v1956_v5  ;;  %v1349_v31 = vmul.f32 %v1227_v10, %v927_v6  ;;  %v1965_v42 = vpop.permute.xlu0 %1964 }
 0x21b   :  { %1799 = vmatpush.msra.mxu3 %v2331_v12  ;;  %v1967_v22 = vunpack.i.h.bf16 %v1965_v42  ;;  %v1966_v23 = vunpack.i.l.bf16 %v1965_v42  ;;  %1529 = vmatpush.msra.mxu1 %v1962_v14 }
 0x21c   :  { %1567 = vmatpush.msra.mxu0 %v1961_v21 }
 0x21d   :  { %1800 = vmatpush.msra.mxu3 %v2291_v18  ;;  %1530 = vmatpush.msra.mxu1 %v1967_v22  ;;  %v1246_v18 = vpop.f32.mrf.mxu3 }
 0x21e   :  { %1568 = vmatpush.msra.mxu0 %v1966_v23  ;;  %1531 = vmatmul.f32.vlgmr.msra.gmra.mxu1 %v1349_v31  ;;  %v1970_v59 = vpop.permute.xlu1 %1969 }
 0x21f   :  { %1801 = vmatpush.msra.mxu3 %v2338_v19  ;;  %v1972_v49 = vunpack.i.h.bf16 %v1970_v59  ;;  %v1971_v32 = vunpack.i.l.bf16 %v1970_v59  ;;  %1749 = vmatpush.msrb.mxu1 %v2210_v20  ;;  %v967_v20 = vadd.f32 %v2352_v40, %v2348_v38 }
 0x221   :  { %1802 = vmatpush.msra.mxu3 %v2302_v37  ;;  %1569 = vmatpush.msra.mxu0 %v1971_v32 }
 0x222   :  { %1750 = vmatpush.msrb.mxu1 %v2204_v7 }
 0x223   :  { %1803 = vmatpush.msra.mxu3 %v2313_v51  ;;  %1570 = vmatpush.msra.mxu0 %v1972_v49  ;;  %v1286_v51 = vpop.f32.mrf.mxu2 }
 0x224   :  { %1751 = vmatpush.msrb.mxu1 %v2214_v30  ;;  %v987_v30 = vadd.f32 %v2360_v62, %v967_v20 }
 0x225   :  { %1804 = vmatpush.msra.mxu3 %v2311_v50 }
 0x226   :  { %1752 = vmatpush.msrb.mxu1 %v2252_v26 }
 0x227   :  { %v1346_v12 = vpop.f32.mrf.mxu3 }
 0x228   :  { %1753 = vmatpush.msrb.mxu1 %v2272_v55 }
 0x22a   :  { %1754 = vmatpush.msrb.mxu1 %v2220_v43  ;;  %v1027_v43 = vadd.f32 %v2362_v13, %v2354_v41 }
 0x22c   :  { %v1266_v37 = vpop.f32.mrf.mxu1  ;;  %1755 = vmatpush.msrb.mxu1 %v2227_v53 }
 0x22d   :  { %v1267_v7 = vadd.f32 %v1266_v37, %v1246_v18  ;;  %v225_v18 = vld [vmem:[#allocation5 + $0x498] sm:$0xf]  ;;  %v226_v37 = vld [vmem:[#allocation5 + $0x4a0] sm:$0xf] }
 0x22e   :  { %1756 = vmatpush.msrb.mxu1 %v2294_v25  ;;  %1848 = vmatpush.msk.msrb.mxu0 %vm1659_vm7, %v225_v18 }
 0x22f   :  { %v1287_v50 = vadd.f32 %v1286_v51, %v1267_v7  ;;  %1850 = vmatpush.msk.msrb.mxu2 %vm1659_vm7, %v226_v37  ;;  %v222_v7 = vld [vmem:[#allocation5 + $0x480] sm:$0xff]  ;;  %v223_v51 = vld [vmem:[#allocation5 + $0x488] sm:$0xff] }
 0x230   :  { %1757 = vmatpush.msrb.mxu1 %v2234_v3  ;;  %v2397_v3 = vadd.f32 %v2350_v39, %v1027_v43  ;;  %1683 = vmatpush.msrb.mxu0 %v222_v7  ;;  %v221_v43 = vld [vmem:[#allocation5 + $0x478] sm:$0xff] }
 0x231   :  { %v1350_v26 = vmul.f32 %v1287_v50, %v987_v30  ;;  %1703 = vmatpush.msrb.mxu2 %v223_v51  ;;  %v219_v30 = vld [vmem:[#allocation5 + $0x468] sm:$0xff]  ;;  %v220_v50 = vld [vmem:[#allocation5 + $0x470] sm:$0xff] }
 0x232   :  { %1758 = vmatpush.msrb.mxu1 %v2243_v15  ;;  %1684 = vmatpush.msrb.mxu0 %v219_v30 }
 0x233   :  { %1551 = vmatmul.f32.vlgmr.msrb.gmra.mxu3 %v1350_v26  ;;  %v1326_v53 = vpop.f32.mrf.mxu2  ;;  %1704 = vmatpush.msrb.mxu2 %v220_v50  ;;  %v224_v26 = vld [vmem:[#allocation5 + $0x490] sm:$0xff] }
 0x234   :  { %1759 = vmatpush.msrb.mxu1 %v2258_v35 }
 0x236   :  { %1760 = vmatpush.msrb.mxu1 %v2267_v48 }
 0x237   :  { %v1306_v55 = vpop.f32.mrf.mxu0 }
 0x238   :  { %1761 = vmatpush.msrb.mxu1 %v2281_v0  ;;  %v1327_v25 = vadd.f32 %v1326_v53, %v1306_v55  ;;  %v1978_v53 = vld [vmem:[#allocation8 + $0xf0] sm:$0xff]  ;;  %v1979_v55 = vld [vmem:[#allocation8 + $0xe8] sm:$0xff] }
 0x23a   :  { %1762 = vmatpush.msrb.mxu1 %v2289_v17  ;;  %v1347_v15 = vadd.f32 %v1346_v12, %v1327_v25  ;;  %v1980_v25 = vld [vmem:[#allocation8 + $0xe0] sm:$0xff]  ;;  %v1981_v12 = vld [vmem:[#allocation8 + $0xd8] sm:$0xff] }
 0x23c   :  { %1763 = vmatpush.msrb.mxu1 %v2336_v24  ;;  %v1351_v35 = vmul.f32 %v1347_v15, %v2397_v3 }
 0x23e   :  { %1764 = vmatpush.msrb.mxu1 %v2300_v33  ;;  %1847 = vmatmul.msk.f32.vlgmr.msra.gmra.mxu0 %vm359_vm2, %v1351_v35 }
 0x29b   :  { %v1532_v19 = vpop.f32.mrf.mxu1 }
 0x2b6   :  { %v1552_v48 = vpop.f32.mrf.mxu3 }
 0x2b7   :  { %v1553_v38 = vadd.f32 %v1552_v48, %v1532_v19 }
 0x2bb   :  { %v1572_v0 = vpop.f32.mrf.mxu0 }
 0x2bc   :  { %v1573_v40 = vadd.f32 %v1572_v0, %v1553_v38 }
 0x2be   :  { %1584 = vrot.lane.b32.xlu1 %v1573_v40, %s2120_s3  ;;  %1580 = vrot.lane.b32.xlu0 %v1573_v40, %s2121_s12 }
 0x2bf   :  { %1576 = vrot.lane.b32.xlu2 %v1573_v40, %s2122_s13 }
 0x2c7   :  { %1588 = vrot.lane.b32.xlu2 %v1573_v40, %s2123_s14 }
 0x319   :  { %v1577_v17 = vpop.permute.xlu2 %1576 }
 0x31a   :  { %v1579_v33 = vmax.f32 %v1573_v40, %v1577_v17 }
 0x321   :  { %v1589_v13 = vpop.permute.xlu2 %1588 }
 0x330   :  { %v1581_v24 = vpop.permute.xlu0 %1580  ;;  %v1585_v41 = vpop.permute.xlu1 %1584 }
 0x331   :  { %v1583_v39 = vmax.f32 %v1579_v33, %v1581_v24  ;;  %v2467_v24 = vld [vmem:[#allocation15_spill] sm:$0xff] }
 0x333   :  { %v1587_v62 = vmax.f32 %v1583_v39, %v1585_v41 }
 0x335   :  { %v1591_v29 = vmax.f32 %v1587_v62, %v1589_v13 }
 0x337   :  { %1599 = vrot.lane.b32.xlu2 %v1591_v29, %s2124_s15  ;;  %1596 = vrot.lane.b32.xlu1 %v1591_v29, %s2119_s2 }
 0x338   :  { %1593 = vrot.lane.b32.xlu0 %v1591_v29, %s2125_s16 }
 0x340   :  { %1602 = vrot.lane.b32.xlu0 %v1591_v29, %s2126_s17 }
 0x391   :  { %v1600_v60 = vpop.permute.xlu2 %1599 }
 0x3a9   :  { %v1597_v46 = vpop.permute.xlu1 %1596 }
 0x3aa   :  { %v1594_v45 = vpop.permute.xlu0 %1593 }
 0x3ab   :  { %v1606_v34 = vsel %vm1605_vm3, %v1591_v29, %v1594_v45 }
 0x3ac   :  { %v1608_v52 = vsel %vm1607_vm4, %v1606_v34, %v1597_v46 }
 0x3ad   :  { %v1610_v47 = vsel %vm1609_vm5, %v1608_v52, %v1600_v60 }
 0x3b2   :  { %v1603_v61 = vpop.permute.xlu0 %1602 }
 0x3b3   :  { %v1612_v2 = vsel %vm1611_vm6, %v1610_v47, %v1603_v61 }
 0x3b4   :  { %v1613_v8 = vsub.f32 %v1573_v40, %v1612_v2 }
 0x3b6   :  { %v1614_v5 = vmul.f32 1.442695, %v1613_v8 }
 0x3b8   :  { %1973 = vpow2.f32 %v1614_v5 }
 0x3be   :  { %v2415_v10 = vpop.eup %1973 }
 0x3bf   :  { %1625 = vrot.lane.b32.xlu0 %v2415_v10, %s2120_s3  ;;  %1621 = vrot.lane.b32.xlu2 %v2415_v10, %s2121_s12 }
 0x3c0   :  { %1617 = vrot.lane.b32.xlu1 %v2415_v10, %s2122_s13 }
 0x3c8   :  { %1629 = vrot.lane.b32.xlu1 %v2415_v10, %s2123_s14 }
 0x419   :  { %v1622_v14 = vpop.permute.xlu2 %1621 }
 0x431   :  { %v1626_v31 = vpop.permute.xlu0 %1625 }
 0x432   :  { %v1618_v6 = vpop.permute.xlu1 %1617 }
 0x433   :  { %v1620_v9 = vadd.f32 %v2415_v10, %v1618_v6 }
 0x435   :  { %v1624_v21 = vadd.f32 %v1622_v14, %v1620_v9 }
 0x437   :  { %v1628_v42 = vadd.f32 %v1626_v31, %v1624_v21 }
 0x43a   :  { %v1630_v22 = vpop.permute.xlu1 %1629 }
 0x43b   :  { %v1632_v23 = vadd.f32 %v1630_v22, %v1628_v42 }
 0x43d   :  { %1975 = vrcp.f32 %v1632_v23 }
 0x443   :  { %v1976_v59 = vpop.eup %1975 }
 0x444   :  { %v1634_v49 = vmul.f32 %v1976_v59, %v1632_v23 }
 0x446   :  { %v1635_v32 = vsub.f32 2.0, %v1634_v49 }
 0x448   :  { %v1636_v20 = vmul.f32 %v1976_v59, %v1635_v32 }
 0x44a   :  { %1644 = vrot.lane.b32.xlu1 %v1636_v20, %s2124_s15  ;;  %1641 = vrot.lane.b32.xlu0 %v1636_v20, %s2119_s2 }
 0x44b   :  { %1638 = vrot.lane.b32.xlu2 %v1636_v20, %s2125_s16 }
 0x452   :  { %1736 = vrot.lane.b32.xlu1 %v2364_v63, %s2116_s8  ;;  %1734 = vrot.lane.b32.xlu0 %v2358_v57, %s2116_s8  ;;  %v227_v63 = vld [vmem:[#allocation5 + $0x4a8] sm:$0xf] }
 0x453   :  { %1647 = vrot.lane.b32.xlu2 %v1636_v20, %s2126_s17  ;;  %1852 = vmatpush.msk.msra.mxu0 %vm1659_vm7, %v227_v63  ;;  %v1977_v57 = vld [vmem:[#allocation8 + $0xf8] sm:$0xff] }
 0x454   :  { %1769 = vmatpush.msra.mxu2 %v1977_v57 }
 0x455   :  { %1723 = vmatpush.msra.mxu0 %v224_v26 }
 0x456   :  { %1770 = vmatpush.msra.mxu2 %v1978_v53 }
 0x457   :  { %1724 = vmatpush.msra.mxu0 %v221_v43 }
 0x458   :  { %1771 = vmatpush.msra.mxu2 %v1979_v55 }
 0x45a   :  { %1772 = vmatpush.msra.mxu2 %v1980_v25 }
 0x45b   :  { %1732 = vrot.lane.b32.xlu2 %v2397_v3, %s2116_s8 }
 0x45c   :  { %1773 = vmatpush.msra.mxu2 %v1981_v12 }
 0x45e   :  { %1774 = vmatpush.msra.mxu2 %v2254_v27 }
 0x460   :  { %1775 = vmatpush.msra.mxu2 %v2274_v56 }
 0x462   :  { %1776 = vmatpush.msra.mxu2 %v2222_v44 }
 0x464   :  { %1777 = vmatpush.msra.mxu2 %v2229_v54 }
 0x466   :  { %1778 = vmatpush.msra.mxu2 %v2296_v28 }
 0x468   :  { %1779 = vmatpush.msra.mxu2 %v2236_v4 }
 0x46a   :  { %1780 = vmatpush.msra.mxu2 %v2245_v16 }
 0x46c   :  { %1781 = vmatpush.msra.mxu2 %v2316_v58 }
 0x46e   :  { %1782 = vmatpush.msra.mxu2 %v2260_v36 }
 0x470   :  { %1783 = vmatpush.msra.mxu2 %v2329_v11 }
 0x472   :  { %1784 = vmatpush.msra.mxu2 %v2283_v1 }
 0x4a5   :  { %v1639_v3 = vpop.permute.xlu2 %1638 }
 0x4a6   :  { %v1650_v15 = vsel %vm1605_vm3, %v1636_v20, %v1639_v3 }
 0x4ad   :  { %v1648_v44 = vpop.permute.xlu2 %1647 }
 0x4b5   :  { %v1733_v28 = vpop.permute.xlu2 %1732 }
 0x4bc   :  { %v1645_v35 = vpop.permute.xlu1 %1644  ;;  %v1642_v48 = vpop.permute.xlu0 %1641 }
 0x4bd   :  { %v1651_v27 = vsel %vm1607_vm4, %v1650_v15, %v1642_v48 }
 0x4be   :  { %v1652_v54 = vsel %vm1609_vm5, %v1651_v27, %v1645_v35 }
 0x4bf   :  { %v1653_v56 = vsel %vm1611_vm6, %v1652_v54, %v1648_v44 }
 0x4c0   :  { %v1654_v4 = vmul.f32 %v2415_v10, %v1653_v56 }
 0x4c2   :  { %1849 = vmatmul.msk.f32.vlgmr.msrb.gmra.mxu0 %vm1655_vm8, %v1654_v4  ;;  %1851 = vmatmul.msk.f32.vlgmr.msrb.gmra.mxu2 %vm1655_vm8, %v1654_v4 }
 0x4c4   :  { %v1735_v16 = vpop.permute.xlu0 %1734  ;;  %v1737_v38 = vpop.permute.xlu1 %1736 }
 0x4c5   :  { %v1738_v36 = vsel %vm359_vm2, %v1733_v28, %v1735_v16  ;;  %v1739_v40 = vsel %vm359_vm2, %v1735_v16, %v1737_v38 }
 0x4ca   :  { %1853 = vmatmul.msk.f32.vlgmr.msra.gmra.mxu0 %vm1655_vm8, %v1654_v4 }
 0x53f   :  { %v1686_v58 = vpop.f32.mrf.mxu0 }
 0x540   :  { %v1743_v19 = vmul.f32 %v1738_v36, %v1686_v58 }
 0x542   :  { %1765 = vmatmul.f32.vlgmr.msrb.gmra.mxu1 %v1743_v19 }
 0x545   :  { %v1706_v0 = vpop.f32.mrf.mxu2 }
 0x546   :  { %v1744_v17 = vmul.f32 %v1739_v40, %v1706_v0 }
 0x547   :  { %v1726_v11 = vpop.f32.mrf.mxu0 }
 0x548   :  { %v1745_v33 = vmul.f32 %v1737_v38, %v1726_v11  ;;  %1785 = vmatmul.f32.vlgmr.msra.gmra.mxu2 %v1744_v17 }
 0x54a   :  { %1854 = vmatmul.msk.f32.vlgmr.msra.gmra.mxu3 %vm359_vm2, %v1745_v33 }
 0x5bf   :  { %v1766_v1 = vpop.f32.mrf.mxu1 }
 0x5c0   :  { %v1767_v39 = vadd.f32 %v1766_v1, %v2467_v24 }
 0x5cb   :  { %v1786_v41 = vpop.f32.mrf.mxu2 }
 0x5cc   :  { %v1787_v62 = vadd.f32 %v1786_v41, %v1767_v39 }
 0x5cd   :  { %v1806_v13 = vpop.f32.mrf.mxu3 }
 0x5ce   :  { %v1807_v29 = vadd.f32 %v1806_v13, %v1787_v62 }
 0x5d0   :  { %v1809_v45 = vmul.f32 0.5, %v1807_v29 }
 0x5d2   :  { %1810 = vst.msk [vmem:[#allocation10] sm:$0xff] %vm359_vm2, %v1809_v45 }
 0x5d3   :  { %1821 = dma.vmem_to_hbm [thread:$0]  %s1817_s19, 128, %s1819_s22, [#allocation4]  }
 0x5d4   :  { %2108 = dma.done.wait [#allocation4], 128  }
 0x5d5   :  { %2109 = vsyncadd [#allocation4], 4294967168 }
 0x5d6   :  { %1826 = vsyncpa [#allocation3], 1 }
 0x5d7   :  { %1827 = vsyncpa [#allocation6], 1 }
 0x5d8   :  { %1828 = vsyncpa [#allocation9], 1 }
 0x5d9   :  { %1829 = vsyncpa [#allocation4], 1 }

</bundles_post_ra>
